<compile_context>
chip_gen: v5e
topology: v5e:2x2
jax: 0.10.0
libtpu: 0.0.40
codegen_flags: <defaults>
</compile_context>

<pallas_src>
import math
import functools

import numpy as np
import jax
import jax.numpy as jnp
from jax import lax
from jax.experimental import pallas as pl
from jax.experimental.pallas import tpu as pltpu


def _round_up(x, m):
    return (x + m - 1) // m * m


def _vmem_capacity_bytes():
    try:
        return int(pltpu.get_tpu_info().vmem_capacity_bytes)
    except Exception:
        return 64 * 1024 * 1024  # conservative (v7x-sized) fallback


def _gated_attn_kernel(r_ref, wa_ref, ba_ref, wb_ref, bb_ref, wgk_ref, bgk_ref,
                       wo_ref, out_ref, kv_ref, z_ref,
                       *, n_heads, d_head, tq, q_off, v_off):
    """One grid step = (batch element b, query tile qt).

    qt == 0    : project fused [K | V] for the whole padded sequence of batch b
                 into the persistent VMEM scratch kv_ref (projection hoist).
    every step : fused [Q | gate_Q] projection for this query tile, then a
                 flash-style online softmax over causal key tiles kt in [0, qt]
                 (tiles above the diagonal are skipped), rank-1 gate as a VPU
                 broadcast, bf16 z slab, one full-depth output matmul.
    """
    H, dh = n_heads, d_head
    HD = H * dh
    TQ = tq
    TK = tq                       # key tile == query tile -> causal trip count qt+1
    S_pad = kv_ref.shape[0]
    n_kv_tiles = S_pad // TK

    dn = (((1,), (0,)), ((), ()))       # A @ B
    dn_t = (((1,), (1,)), ((), ()))     # A @ B.T   (contract last dims)
    dn_gk = (((0,), (1,)), ((), ()))    # W_gK.T @ r_tile.T -> (H, TK)

    qt = pl.program_id(1)
    neg = jnp.float32(-1e30)

    # ---- once per batch element: fused K|V projection into VMEM scratch ----
    @pl.when(qt == 0)
    def _():
        def proj_body(i, carry):
            k0 = pl.multiple_of(i * TK, TK)
            r_t = r_ref[0, pl.ds(k0, TK), :]                          # (TK, D) bf16
            pkv = lax.dot_general(r_t, wb_ref[...], dn,
                                  preferred_element_type=jnp.float32) + bb_ref[...]
            kv_ref[pl.ds(k0, TK), :] = pkv.astype(kv_ref.dtype)
            return carry
        lax.fori_loop(0, n_kv_tiles, proj_body, 0)

    # ---- per query tile: fused Q | gate_Q projection (1/sqrt(dh) folded) ----
    q0 = pl.multiple_of(qt * TQ, TQ)
    rq = r_ref[0, pl.ds(q0, TQ), :]                                    # (TQ, D) bf16
    proj_q = lax.dot_general(rq, wa_ref[...], dn,
                             preferred_element_type=jnp.float32) + ba_ref[...]
    q_bf = proj_q[:, :HD].astype(jnp.bfloat16)                         # (TQ, HD)
    qg = proj_q[:, q_off:q_off + H]                                    # (TQ, H) f32

    qi = lax.broadcasted_iota(jnp.int32, (TQ, TK), 0) + qt * TQ

    wgk = wgk_ref[...]                                                 # (D, H) bf16
    bgk = bgk_ref[...]                                                 # (H, 1) f32

    # ---- flash-style online softmax over causal key tiles kt in [0, qt] ----
    m0 = jnp.full((TQ, 1), neg, dtype=jnp.float32)
    l0 = jnp.zeros((TQ, 1), dtype=jnp.float32)
    a0 = jnp.zeros((TQ, dh), dtype=jnp.float32)
    init = tuple((m0, l0, a0) for _ in range(H))

    def kv_body(kt, carry):
        k0 = pl.multiple_of(kt * TK, TK)
        kv_t = kv_ref[pl.ds(k0, TK), :]                                # (TK, *) bf16
        r_t = r_ref[0, pl.ds(k0, TK), :]                               # (TK, D) bf16
        # key gate for this tile, produced already transposed -> (H, TK);
        # recomputing it per tile is O(TK*D*H) (tiny vs. the hoisted K|V proj)
        # and avoids any lane-dim dynamic slicing / in-kernel transposes.
        kg_t = lax.dot_general(wgk, r_t, dn_gk,
                               preferred_element_type=jnp.float32) + bgk
        ki = lax.broadcasted_iota(jnp.int32, (TQ, TK), 1) + kt * TK
        not_causal = ki > qi

        new_carry = []
        for h in range(H):
            m, l, acc = carry[h]
            k_h = kv_t[:, h * dh:(h + 1) * dh]
            v_h = kv_t[:, v_off + h * dh:v_off + (h + 1) * dh]
            s = lax.dot_general(q_bf[:, h * dh:(h + 1) * dh], k_h, dn_t,
                                preferred_element_type=jnp.float32)   # (TQ, TK)
            s = jnp.where(not_causal, neg, s)
            m_new = jnp.maximum(m, jnp.max(s, axis=-1, keepdims=True))
            alpha = jnp.exp(m - m_new)
            e = jnp.exp(s - m_new)
            # rank-1 attention gate as a VPU broadcast outer product
            gate = jnp.clip(qg[:, h:h + 1] * kg_t[h:h + 1, :], 0.0, 1.0)
            l_new = alpha * l + jnp.sum(e, axis=-1, keepdims=True)
            pv = lax.dot_general((gate * e).astype(jnp.bfloat16), v_h, dn,
                                 preferred_element_type=jnp.float32)  # (TQ, dh)
            new_carry.append((m_new, l_new, alpha * acc + pv))
        return tuple(new_carry)

    carry = lax.fori_loop(0, qt + 1, kv_body, init)

    # ---- normalize, pack z into a bf16 VMEM slab, one output matmul --------
    for h in range(H):
        _, l, acc = carry[h]
        inv_l = pl.reciprocal(l, approx=True)
        z_ref[:, h * dh:(h + 1) * dh] = (acc * inv_l).astype(z_ref.dtype)

    out = lax.dot_general(z_ref[...], wo_ref[...], dn,
                          preferred_element_type=jnp.float32)
    out_ref[0] = out.astype(out_ref.dtype)

    # TODO(synk): reg_attn_gate (p=0.6 norm of attn_gate over heads) and the
    # module's self.cache dict are side-effects never returned by forward();
    # they are intentionally not computed here.


def modified_attention_forward(r, params, *, q_tile=None):
    W_Q, W_K, W_V, W_O = params["W_Q"], params["W_K"], params["W_V"], params["W_O"]
    b_Q, b_K, b_V = params["b_Q"], params["b_K"], params["b_V"]
    W_gQ, W_gK = params["W_gate_Q"], params["W_gate_K"]
    b_gQ, b_gK = params["b_gate_Q"], params["b_gate_K"]

    B, S, D = r.shape
    H, _, dh = W_Q.shape
    HD = H * dh
    eps = 1e-12  # matches torch.nn.functional.normalize default eps
    scale = 1.0 / math.sqrt(dh)

    # ---- per-generation tiling / VMEM limit ---------------------------------
    vmem_cap = _vmem_capacity_bytes()
    if q_tile is None:
        q_tile = 128 if vmem_cap <= 64 * 1024 * 1024 else 256  # v7x vs v5e/v6e
    TQ = max(16, min(_round_up(q_tile, 16), _round_up(S, 16)))
    S_pad = _round_up(S, TQ)
    n_qt = S_pad // TQ
    vmem_limit = int(min(0.75 * vmem_cap, 100 * 1024 * 1024))

    # lane-aligned fused layouts: gate / V column groups start on 128-lane edges
    QPAD = _round_up(HD, 128)
    KPAD = _round_up(HD, 128)

    # ---- parameter prep (plain JAX glue) -------------------------------------
    W_V_n = W_V / jnp.maximum(jnp.linalg.norm(W_V, axis=1, keepdims=True), eps)
    W_O_n = W_O / jnp.maximum(jnp.linalg.norm(W_O, axis=2, keepdims=True), eps)

    def heads_to_cols(w):  # (H, D, dh) -> (D, H*dh), head-major columns
        return jnp.transpose(w, (1, 0, 2)).reshape(D, HD)

    zc = lambda n: jnp.zeros((D, n), jnp.float32)
    zb = lambda n: jnp.zeros((1, n), jnp.float32)

    # fused [scaled W_Q | pad | W_gate_Q] -> one wide query-side matmul
    W_A = jnp.concatenate([heads_to_cols(W_Q) * scale, zc(QPAD - HD),
                           jnp.transpose(W_gQ[:, :, 0])], axis=1).astype(jnp.bfloat16)
    b_A = jnp.concatenate([b_Q.reshape(1, HD) * scale, zb(QPAD - HD),
                           b_gQ.reshape(1, H)], axis=1)
    # fused [W_K | pad | W_V_normed] -> one wide key/value-side matmul
    W_B = jnp.concatenate([heads_to_cols(W_K), zc(KPAD - HD),
                           heads_to_cols(W_V_n)], axis=1).astype(jnp.bfloat16)
    b_B = jnp.concatenate([b_K.reshape(1, HD), zb(KPAD - HD),
                           b_V.reshape(1, HD)], axis=1)
    W_GK = jnp.transpose(W_gK[:, :, 0]).astype(jnp.bfloat16)   # (D, H)
    b_GK = b_gK.reshape(H, 1)                                  # (H, 1)
    W_Of = W_O_n.reshape(HD, D).astype(jnp.bfloat16)           # (HD, D)

    r_bf = r.astype(jnp.bfloat16)
    if S_pad != S:
        # zero rows at the tail: real (causal) queries never attend to them.
        r_bf = jnp.pad(r_bf, ((0, 0), (0, S_pad - S), (0, 0)))

    kernel = functools.partial(_gated_attn_kernel, n_heads=H, d_head=dh,
                               tq=TQ, q_off=QPAD, v_off=KPAD)

    def full2d(a):
        # Constant-index weight blocks; Pallas keeps them resident across steps.
        # TODO(synk): single-buffer these (pl.Buffered(1)) once stable in this
        # jax version to halve their VMEM residency.
        return pl.BlockSpec(a.shape, lambda b, qt: (0, 0))

    out = pl.pallas_call(
        kernel,
        out_shape=jax.ShapeDtypeStruct((B, S_pad, D), jnp.float32),
        grid_spec=pltpu.PrefetchScalarGridSpec(
            num_scalar_prefetch=0,
            grid=(B, n_qt),
            in_specs=[
                pl.BlockSpec((1, S_pad, D), lambda b, qt: (b, 0, 0)),  # residual (one copy)
                full2d(W_A), full2d(b_A),        # fused Q | gate_Q
                full2d(W_B), full2d(b_B),        # fused K | V
                full2d(W_GK), full2d(b_GK),      # gate_K
                full2d(W_Of),                    # fused W_O
            ],
            out_specs=pl.BlockSpec((1, TQ, D), lambda b, qt: (b, qt, 0)),
            scratch_shapes=[
                pltpu.VMEM((S_pad, KPAD + HD), jnp.bfloat16),  # per-batch K|V cache
                pltpu.VMEM((TQ, HD), jnp.bfloat16),            # z slab
            ]),
        compiler_params=pltpu.CompilerParams(
            # batch split across TensorCores; query tiles run in order so the
            # qt==0 K|V projection is visible to later tiles of the same batch.
            dimension_semantics=("parallel", "arbitrary"),
            vmem_limit_bytes=vmem_limit),
    )(r_bf, W_A, b_A, W_B, b_B, W_GK, b_GK, W_Of)

    return out[:, :S, :]


def reference_forward(r, params):
    """Pure-JAX f32 mirror of the PyTorch forward (for correctness checking)."""
    P = jax.lax.Precision.HIGHEST
    W_Q, W_K, W_V, W_O = params["W_Q"], params["W_K"], params["W_V"], params["W_O"]
    b_Q, b_K, b_V = params["b_Q"], params["b_K"], params["b_V"]
    W_gQ, W_gK = params["W_gate_Q"], params["W_gate_K"]
    b_gQ, b_gK = params["b_gate_Q"], params["b_gate_K"]
    eps = 1e-12
    W_V_n = W_V / jnp.maximum(jnp.linalg.norm(W_V, axis=1, keepdims=True), eps)
    W_O_n = W_O / jnp.maximum(jnp.linalg.norm(W_O, axis=2, keepdims=True), eps)

    B, S, D = r.shape
    H, _, dh = W_Q.shape

    queries = jnp.einsum('hmd,bqm->bqhd', W_Q, r, precision=P) + b_Q
    query_gate = jnp.einsum('hmg,bqm->bqhg', W_gQ, r, precision=P) + b_gQ
    keys = jnp.einsum('hmd,bkm->bkhd', W_K, r, precision=P) + b_K
    key_gate = jnp.einsum('hmg,bkm->bkhg', W_gK, r, precision=P) + b_gK
    values = jnp.einsum('hmd,bkm->bkhd', W_V_n, r, precision=P) + b_V

    attn_scores = jnp.einsum('bqhd,bkhd->bhqk', queries, keys, precision=P)
    attn_gate = jnp.clip(jnp.einsum('bqhg,bkhg->bhqk', query_gate, key_gate,
                                    precision=P), 0.0, 1.0)

    scaled = attn_scores / math.sqrt(dh)
    mask = jnp.triu(jnp.ones((S, S), dtype=bool), k=1)
    masked = jnp.where(mask[None, None, :, :], -jnp.inf, scaled)
    softmax_attn = jax.nn.softmax(masked, axis=-1)

    gated = attn_gate * softmax_attn
    z = jnp.einsum('bhqk,bkhd->bhqd', gated, values, precision=P)
    out = jnp.einsum('bhqd,hdm->bqm', z, W_O_n, precision=P)
    return out


def init_params(key, n_heads, d_model, d_head, d_gate=1):
    """Deterministic synthetic init (mirrors the !use_duplicate_weights branch:
    all weights are freshly-initialized noise; gate biases are zeros)."""
    ks = jax.random.split(key, 10)

    def xavier(k, shape, fan_in, fan_out):
        std = math.sqrt(2.0 / (fan_in + fan_out))
        return jax.random.normal(k, shape, dtype=jnp.float32) * std

    params = {
        "W_Q": xavier(ks[0], (n_heads, d_model, d_head), d_model, d_head),
        "W_K": xavier(ks[1], (n_heads, d_model, d_head), d_model, d_head),
        "W_V": xavier(ks[2], (n_heads, d_model, d_head), d_model, d_head),
        "W_O": xavier(ks[3], (n_heads, d_head, d_model), d_head, d_model),
        "b_Q": xavier(ks[4], (n_heads, d_head), n_heads, d_head),
        "b_K": xavier(ks[5], (n_heads, d_head), n_heads, d_head),
        "b_V": xavier(ks[6], (n_heads, d_head), n_heads, d_head),
        # nn.init.orthogonal_ approximated by unit-norm random columns (deterministic)
        "W_gate_Q": jax.random.normal(ks[7], (n_heads, d_model, d_gate), dtype=jnp.float32),
        "W_gate_K": jax.random.normal(ks[8], (n_heads, d_model, d_gate), dtype=jnp.float32),
        "b_gate_Q": jnp.zeros((n_heads, d_gate), dtype=jnp.float32),
        "b_gate_K": jnp.zeros((n_heads, d_gate), dtype=jnp.float32),
    }
    params["W_gate_Q"] = params["W_gate_Q"] / jnp.linalg.norm(
        params["W_gate_Q"], axis=1, keepdims=True)
    params["W_gate_K"] = params["W_gate_K"] / jnp.linalg.norm(
        params["W_gate_K"], axis=1, keepdims=True)
    return params


if __name__ == "__main__":
    # small shapes: original_n_heads=2, expansion_factor=2 -> n_heads=4
    batch, d_model, d_head, n_heads = 2, 32, 8, 4

    key = jax.random.PRNGKey(0)
    k_r, k_p = jax.random.split(key)
    params = init_params(k_p, n_heads, d_model, d_head)

    # Snap test inputs to bf16-representable values so the comparison against
    # the f32 reference measures kernel correctness rather than input
    # quantization noise (the kernel feeds the MXU in bf16, accumulates in f32).
    snap = lambda x: x.astype(jnp.bfloat16).astype(jnp.float32)
    params = {k: snap(v) for k, v in params.items()}

    # config 1: tiny sequence (single query/key tile)
    # config 2: forced small tile -> multi-tile path, exercising the causal
    #           key-tile skipping, online softmax and sequence padding (56->64).
    for seq, q_tile in ((8, None), (56, 16)):
        r = snap(jax.random.normal(jax.random.fold_in(k_r, seq),
                                   (batch, seq, d_model), dtype=jnp.float32))
        out = jax.block_until_ready(modified_attention_forward(r, params, q_tile=q_tile))
        ref = jax.block_until_ready(reference_forward(r, params))
        # tolerance loosened vs the f32 reference to cover bf16 MXU inputs and
        # the EUP approximate reciprocal (accumulation/softmax stay in f32).
        np.testing.assert_allclose(np.asarray(out), np.asarray(ref),
                                   rtol=5e-2, atol=3e-2)

    print("KERNEL_OK")
</pallas_src>

<mosaic_0001>
module attributes {stable_mosaic.version = 11 : i64} {
  func.func @_gated_attn_kernel(%arg0: i32, %arg1: i32, %arg2: memref<1x16x32xbf16, #tpu.memory_space<vmem>>, %arg3: memref<32x132xbf16, #tpu.memory_space<vmem>>, %arg4: memref<1x132xf32, #tpu.memory_space<vmem>>, %arg5: memref<32x160xbf16, #tpu.memory_space<vmem>>, %arg6: memref<1x160xf32, #tpu.memory_space<vmem>>, %arg7: memref<32x4xbf16, #tpu.memory_space<vmem>>, %arg8: memref<4x1xf32, #tpu.memory_space<vmem>>, %arg9: memref<32x32xbf16, #tpu.memory_space<vmem>>, %arg10: memref<1x16x32xf32, #tpu.memory_space<vmem>>, %arg11: memref<16x160xbf16, #tpu.memory_space<vmem>>, %arg12: memref<16x32xbf16, #tpu.memory_space<vmem>>) attributes {dimension_semantics = [#tpu.dimension_semantics<parallel>, #tpu.dimension_semantics<arbitrary>], iteration_bounds = array<i64: 2, 1>, scalar_prefetch = 0 : i64, scratch_operands = 2 : i64, tpu.core_type = #tpu.core_type<tc>, window_params = [{transform_indices = @transform_0, window_bounds = array<i64: 1, 16, 32>}, {pipeline_mode = #tpu.pipeline_mode<synchronous>, transform_indices = @transform_1, window_bounds = array<i64: 32, 132>}, {pipeline_mode = #tpu.pipeline_mode<synchronous>, transform_indices = @transform_2, window_bounds = array<i64: 1, 132>}, {pipeline_mode = #tpu.pipeline_mode<synchronous>, transform_indices = @transform_3, window_bounds = array<i64: 32, 160>}, {pipeline_mode = #tpu.pipeline_mode<synchronous>, transform_indices = @transform_4, window_bounds = array<i64: 1, 160>}, {pipeline_mode = #tpu.pipeline_mode<synchronous>, transform_indices = @transform_5, window_bounds = array<i64: 32, 4>}, {pipeline_mode = #tpu.pipeline_mode<synchronous>, transform_indices = @transform_6, window_bounds = array<i64: 4, 1>}, {pipeline_mode = #tpu.pipeline_mode<synchronous>, transform_indices = @transform_7, window_bounds = array<i64: 32, 32>}, {transform_indices = @transform_8, window_bounds = array<i64: 1, 16, 32>}]} {
    %c0_i32 = arith.constant 0 : i32
    %0 = arith.cmpi eq, %arg1, %c0_i32 : i32
    %1 = arith.extui %0 : i1 to i32
    %c0_i32_0 = arith.constant 0 : i32
    %2 = arith.cmpi ne, %1, %c0_i32_0 : i32
    scf.if %2 {
      %c0_i32_30 = arith.constant 0 : i32
      %c16_i32_31 = arith.constant 16 : i32
      %55 = arith.muli %c0_i32_30, %c16_i32_31 : i32
      %56 = tpu.assume_multiple %55, 16 : i32
      %c0_32 = arith.constant 0 : index
      %57 = arith.index_cast %56 : i32 to index
      %c0_33 = arith.constant 0 : index
      %58 = vector.load %arg2[%c0_32, %57, %c0_33] : memref<1x16x32xbf16, #tpu.memory_space<vmem>>, vector<1x16x32xbf16>
      %59 = vector.shape_cast %58 : vector<1x16x32xbf16> to vector<16x32xbf16>
      %c0_34 = arith.constant 0 : index
      %c0_35 = arith.constant 0 : index
      %60 = vector.load %arg5[%c0_34, %c0_35] : memref<32x160xbf16, #tpu.memory_space<vmem>>, vector<32x160xbf16>
      %cst_36 = arith.constant dense<0.000000e+00> : vector<16x160xf32>
      %61 = tpu.matmul %59, %60, %cst_36 {dimension_numbers = #tpu.dot_dimension_numbers<[1], [0], [0], [1], [0, 0, 1, 1], [], []>} : vector<16x32xbf16>, vector<32x160xbf16>, vector<16x160xf32> -> vector<16x160xf32>
      %c0_37 = arith.constant 0 : index
      %c0_38 = arith.constant 0 : index
      %62 = vector.load %arg6[%c0_37, %c0_38] : memref<1x160xf32, #tpu.memory_space<vmem>>, vector<1x160xf32>
      %63 = vector.broadcast %62 : vector<1x160xf32> to vector<16x160xf32>
      %64 = arith.addf %61, %63 : vector<16x160xf32>
      %65 = arith.truncf %64 : vector<16x160xf32> to vector<16x160xbf16>
      %66 = arith.index_cast %56 : i32 to index
      %c0_39 = arith.constant 0 : index
      %67 = vector.load %arg11[%66, %c0_39] : memref<16x160xbf16, #tpu.memory_space<vmem>>, vector<16x160xbf16>
      tpu.vector_store %arg11[%66, %c0_39], %65 {strides = array<i32>} : memref<16x160xbf16, #tpu.memory_space<vmem>>, vector<16x160xbf16>,
      %c1_i32_40 = arith.constant 1 : i32
    } else {
    }
    %c16_i32 = arith.constant 16 : i32
    %3 = arith.muli %arg1, %c16_i32 : i32
    %4 = tpu.assume_multiple %3, 16 : i32
    %c0 = arith.constant 0 : index
    %5 = arith.index_cast %4 : i32 to index
    %c0_1 = arith.constant 0 : index
    %6 = vector.load %arg2[%c0, %5, %c0_1] : memref<1x16x32xbf16, #tpu.memory_space<vmem>>, vector<1x16x32xbf16>
    %7 = vector.shape_cast %6 : vector<1x16x32xbf16> to vector<16x32xbf16>
    %c0_2 = arith.constant 0 : index
    %c0_3 = arith.constant 0 : index
    %8 = vector.load %arg3[%c0_2, %c0_3] : memref<32x132xbf16, #tpu.memory_space<vmem>>, vector<32x132xbf16>
    %cst = arith.constant dense<0.000000e+00> : vector<16x132xf32>
    %9 = tpu.matmul %7, %8, %cst {dimension_numbers = #tpu.dot_dimension_numbers<[1], [0], [0], [1], [0, 0, 1, 1], [], []>} : vector<16x32xbf16>, vector<32x132xbf16>, vector<16x132xf32> -> vector<16x132xf32>
    %c0_4 = arith.constant 0 : index
    %c0_5 = arith.constant 0 : index
    %10 = vector.load %arg4[%c0_4, %c0_5] : memref<1x132xf32, #tpu.memory_space<vmem>>, vector<1x132xf32>
    %11 = vector.broadcast %10 : vector<1x132xf32> to vector<16x132xf32>
    %12 = arith.addf %9, %11 : vector<16x132xf32>
    %13 = vector.extract_strided_slice %12 {offsets = [0, 0], sizes = [16, 32], strides = [1, 1]} : vector<16x132xf32> to vector<16x32xf32>
    %14 = arith.truncf %13 : vector<16x32xf32> to vector<16x32xbf16>
    %15 = vector.extract_strided_slice %12 {offsets = [0, 128], sizes = [16, 4], strides = [1, 1]} : vector<16x132xf32> to vector<16x4xf32>
    %16 = tpu.iota {dimensions = array<i32: 0>} : vector<16x16xi32>
    %c16_i32_6 = arith.constant 16 : i32
    %17 = arith.muli %arg1, %c16_i32_6 : i32
    %18 = vector.broadcast %17 : i32 to vector<16x16xi32>
    %19 = arith.addi %16, %18 : vector<16x16xi32>
    %c0_7 = arith.constant 0 : index
    %c0_8 = arith.constant 0 : index
    %20 = vector.load %arg7[%c0_7, %c0_8] : memref<32x4xbf16, #tpu.memory_space<vmem>>, vector<32x4xbf16>
    %c0_9 = arith.constant 0 : index
    %c0_10 = arith.constant 0 : index
    %21 = vector.load %arg8[%c0_9, %c0_10] : memref<4x1xf32, #tpu.memory_space<vmem>>, vector<4x1xf32>
    %cst_11 = arith.constant -1.000000e+30 : f32
    %22 = vector.broadcast %cst_11 : f32 to vector<16x1xf32>
    %cst_12 = arith.constant 0.000000e+00 : f32
    %23 = vector.broadcast %cst_12 : f32 to vector<16x1xf32>
    %cst_13 = arith.constant 0.000000e+00 : f32
    %24 = vector.broadcast %cst_13 : f32 to vector<16x8xf32>
    %c1_i32 = arith.constant 1 : i32
    %25 = arith.addi %arg1, %c1_i32 : i32
    %cst_14 = arith.constant -1.000000e+30 : f32
    %c0_i32_15 = arith.constant 0 : i32
    %26 = arith.subi %25, %c0_i32_15 : i32
    %27 = arith.addi %c0_i32_15, %26 : i32
    %c1_i32_16 = arith.constant 1 : i32
    %28:12 = scf.for %arg13 = %c0_i32_15 to %27 step %c1_i32_16 iter_args(%arg14 = %22, %arg15 = %23, %arg16 = %24, %arg17 = %22, %arg18 = %23, %arg19 = %24, %arg20 = %22, %arg21 = %23, %arg22 = %24, %arg23 = %22, %arg24 = %23, %arg25 = %24) -> (vector<16x1xf32>, vector<16x1xf32>, vector<16x8xf32>, vector<16x1xf32>, vector<16x1xf32>, vector<16x8xf32>, vector<16x1xf32>, vector<16x1xf32>, vector<16x8xf32>, vector<16x1xf32>, vector<16x1xf32>, vector<16x8xf32>)  : i32 {
      %c16_i32_30 = arith.constant 16 : i32
      %55 = arith.muli %arg13, %c16_i32_30 : i32
      %56 = tpu.assume_multiple %55, 16 : i32
      %57 = arith.index_cast %56 : i32 to index
      %c0_31 = arith.constant 0 : index
      %58 = vector.load %arg11[%57, %c0_31] : memref<16x160xbf16, #tpu.memory_space<vmem>>, vector<16x160xbf16>
      %c0_32 = arith.constant 0 : index
      %59 = arith.index_cast %56 : i32 to index
      %c0_33 = arith.constant 0 : index
      %60 = vector.load %arg2[%c0_32, %59, %c0_33] : memref<1x16x32xbf16, #tpu.memory_space<vmem>>, vector<1x16x32xbf16>
      %61 = vector.shape_cast %60 : vector<1x16x32xbf16> to vector<16x32xbf16>
      %cst_34 = arith.constant dense<0.000000e+00> : vector<4x16xf32>
      %62 = tpu.matmul %20, %61, %cst_34 {dimension_numbers = #tpu.dot_dimension_numbers<[0], [1], [1], [0], [0, 1, 1, 0], [], []>} : vector<32x4xbf16>, vector<16x32xbf16>, vector<4x16xf32> -> vector<4x16xf32>
      %63 = vector.broadcast %21 : vector<4x1xf32> to vector<4x16xf32>
      %64 = arith.addf %62, %63 : vector<4x16xf32>
      %65 = tpu.iota {dimensions = array<i32: 1>} : vector<16x16xi32>
      %c16_i32_35 = arith.constant 16 : i32
      %66 = arith.muli %arg13, %c16_i32_35 : i32
      %67 = vector.broadcast %66 : i32 to vector<16x16xi32>
      %68 = arith.addi %65, %67 : vector<16x16xi32>
      %69 = arith.cmpi sgt, %68, %19 : vector<16x16xi32>
      %70 = vector.extract_strided_slice %58 {offsets = [0, 0], sizes = [16, 8], strides = [1, 1]} : vector<16x160xbf16> to vector<16x8xbf16>
      %71 = vector.extract_strided_slice %58 {offsets = [0, 128], sizes = [16, 8], strides = [1, 1]} : vector<16x160xbf16> to vector<16x8xbf16>
      %72 = vector.extract_strided_slice %14 {offsets = [0, 0], sizes = [16, 8], strides = [1, 1]} : vector<16x32xbf16> to vector<16x8xbf16>
      %cst_36 = arith.constant dense<0.000000e+00> : vector<16x16xf32>
      %73 = tpu.matmul %72, %70, %cst_36 {dimension_numbers = #tpu.dot_dimension_numbers<[1], [1], [0], [0], [0, 0, 1, 0], [], []>} : vector<16x8xbf16>, vector<16x8xbf16>, vector<16x16xf32> -> vector<16x16xf32>
      %74 = vector.broadcast %cst_14 : f32 to vector<16x16xf32>
      %75 = arith.select %69, %74, %73 : vector<16x16xi1>, vector<16x16xf32>
      %cst_37 = arith.constant dense<0xFF800000> : vector<16xf32>
      %76 = vector.multi_reduction <maximumf>, %75, %cst_37 [1] : vector<16x16xf32> to vector<16xf32>
      %77 = vector.shape_cast %76 : vector<16xf32> to vector<16x1xf32>
      %78 = arith.maximumf %arg14, %77 : vector<16x1xf32>
      %79 = arith.subf %arg14, %78 : vector<16x1xf32>
      %80 = math.exp %79 : vector<16x1xf32>
      %81 = vector.broadcast %78 : vector<16x1xf32> to vector<16x16xf32>
      %82 = arith.subf %75, %81 : vector<16x16xf32>
      %83 = math.exp %82 : vector<16x16xf32>
      %84 = vector.extract_strided_slice %15 {offsets = [0, 0], sizes = [16, 1], strides = [1, 1]} : vector<16x4xf32> to vector<16x1xf32>
      %85 = vector.extract_strided_slice %64 {offsets = [0, 0], sizes = [1, 16], strides = [1, 1]} : vector<4x16xf32> to vector<1x16xf32>
      %86 = vector.broadcast %84 : vector<16x1xf32> to vector<16x16xf32>
      %87 = vector.broadcast %85 : vector<1x16xf32> to vector<16x16xf32>
      %88 = arith.mulf %86, %87 : vector<16x16xf32>
      %cst_38 = arith.constant 0.000000e+00 : f32
      %cst_39 = arith.constant 1.000000e+00 : f32
      %89 = vector.broadcast %cst_38 : f32 to vector<16x16xf32>
      %90 = arith.maximumf %89, %88 : vector<16x16xf32>
      %91 = vector.broadcast %cst_39 : f32 to vector<16x16xf32>
      %92 = arith.minimumf %91, %90 : vector<16x16xf32>
      %93 = arith.mulf %80, %arg15 : vector<16x1xf32>
      %cst_40 = arith.constant dense<0.000000e+00> : vector<16xf32>
      %94 = vector.multi_reduction <add>, %83, %cst_40 [1] : vector<16x16xf32> to vector<16xf32>
      %95 = vector.shape_cast %94 : vector<16xf32> to vector<16x1xf32>
      %96 = arith.addf %93, %95 : vector<16x1xf32>
      %97 = arith.mulf %92, %83 : vector<16x16xf32>
      %98 = arith.truncf %97 : vector<16x16xf32> to vector<16x16xbf16>
      %cst_41 = arith.constant dense<0.000000e+00> : vector<16x8xf32>
      %99 = tpu.matmul %98, %71, %cst_41 {dimension_numbers = #tpu.dot_dimension_numbers<[1], [0], [0], [1], [0, 0, 1, 1], [], []>} : vector<16x16xbf16>, vector<16x8xbf16>, vector<16x8xf32> -> vector<16x8xf32>
      %100 = vector.broadcast %80 : vector<16x1xf32> to vector<16x8xf32>
      %101 = arith.mulf %100, %arg16 : vector<16x8xf32>
      %102 = arith.addf %101, %99 : vector<16x8xf32>
      %103 = vector.extract_strided_slice %58 {offsets = [0, 8], sizes = [16, 8], strides = [1, 1]} : vector<16x160xbf16> to vector<16x8xbf16>
      %104 = vector.extract_strided_slice %58 {offsets = [0, 136], sizes = [16, 8], strides = [1, 1]} : vector<16x160xbf16> to vector<16x8xbf16>
      %105 = vector.extract_strided_slice %14 {offsets = [0, 8], sizes = [16, 8], strides = [1, 1]} : vector<16x32xbf16> to vector<16x8xbf16>
      %cst_42 = arith.constant dense<0.000000e+00> : vector<16x16xf32>
      %106 = tpu.matmul %105, %103, %cst_42 {dimension_numbers = #tpu.dot_dimension_numbers<[1], [1], [0], [0], [0, 0, 1, 0], [], []>} : vector<16x8xbf16>, vector<16x8xbf16>, vector<16x16xf32> -> vector<16x16xf32>
      %107 = vector.broadcast %cst_14 : f32 to vector<16x16xf32>
      %108 = arith.select %69, %107, %106 : vector<16x16xi1>, vector<16x16xf32>
      %cst_43 = arith.constant dense<0xFF800000> : vector<16xf32>
      %109 = vector.multi_reduction <maximumf>, %108, %cst_43 [1] : vector<16x16xf32> to vector<16xf32>
      %110 = vector.shape_cast %109 : vector<16xf32> to vector<16x1xf32>
      %111 = arith.maximumf %arg17, %110 : vector<16x1xf32>
      %112 = arith.subf %arg17, %111 : vector<16x1xf32>
      %113 = math.exp %112 : vector<16x1xf32>
      %114 = vector.broadcast %111 : vector<16x1xf32> to vector<16x16xf32>
      %115 = arith.subf %108, %114 : vector<16x16xf32>
      %116 = math.exp %115 : vector<16x16xf32>
      %117 = vector.extract_strided_slice %15 {offsets = [0, 1], sizes = [16, 1], strides = [1, 1]} : vector<16x4xf32> to vector<16x1xf32>
      %118 = vector.extract_strided_slice %64 {offsets = [1, 0], sizes = [1, 16], strides = [1, 1]} : vector<4x16xf32> to vector<1x16xf32>
      %119 = vector.broadcast %117 : vector<16x1xf32> to vector<16x16xf32>
      %120 = vector.broadcast %118 : vector<1x16xf32> to vector<16x16xf32>
      %121 = arith.mulf %119, %120 : vector<16x16xf32>
      %cst_44 = arith.constant 0.000000e+00 : f32
      %cst_45 = arith.constant 1.000000e+00 : f32
      %122 = vector.broadcast %cst_44 : f32 to vector<16x16xf32>
      %123 = arith.maximumf %122, %121 : vector<16x16xf32>
      %124 = vector.broadcast %cst_45 : f32 to vector<16x16xf32>
      %125 = arith.minimumf %124, %123 : vector<16x16xf32>
      %126 = arith.mulf %113, %arg18 : vector<16x1xf32>
      %cst_46 = arith.constant dense<0.000000e+00> : vector<16xf32>
      %127 = vector.multi_reduction <add>, %116, %cst_46 [1] : vector<16x16xf32> to vector<16xf32>
      %128 = vector.shape_cast %127 : vector<16xf32> to vector<16x1xf32>
      %129 = arith.addf %126, %128 : vector<16x1xf32>
      %130 = arith.mulf %125, %116 : vector<16x16xf32>
      %131 = arith.truncf %130 : vector<16x16xf32> to vector<16x16xbf16>
      %cst_47 = arith.constant dense<0.000000e+00> : vector<16x8xf32>
      %132 = tpu.matmul %131, %104, %cst_47 {dimension_numbers = #tpu.dot_dimension_numbers<[1], [0], [0], [1], [0, 0, 1, 1], [], []>} : vector<16x16xbf16>, vector<16x8xbf16>, vector<16x8xf32> -> vector<16x8xf32>
      %133 = vector.broadcast %113 : vector<16x1xf32> to vector<16x8xf32>
      %134 = arith.mulf %133, %arg19 : vector<16x8xf32>
      %135 = arith.addf %134, %132 : vector<16x8xf32>
      %136 = vector.extract_strided_slice %58 {offsets = [0, 16], sizes = [16, 8], strides = [1, 1]} : vector<16x160xbf16> to vector<16x8xbf16>
      %137 = vector.extract_strided_slice %58 {offsets = [0, 144], sizes = [16, 8], strides = [1, 1]} : vector<16x160xbf16> to vector<16x8xbf16>
      %138 = vector.extract_strided_slice %14 {offsets = [0, 16], sizes = [16, 8], strides = [1, 1]} : vector<16x32xbf16> to vector<16x8xbf16>
      %cst_48 = arith.constant dense<0.000000e+00> : vector<16x16xf32>
      %139 = tpu.matmul %138, %136, %cst_48 {dimension_numbers = #tpu.dot_dimension_numbers<[1], [1], [0], [0], [0, 0, 1, 0], [], []>} : vector<16x8xbf16>, vector<16x8xbf16>, vector<16x16xf32> -> vector<16x16xf32>
      %140 = vector.broadcast %cst_14 : f32 to vector<16x16xf32>
      %141 = arith.select %69, %140, %139 : vector<16x16xi1>, vector<16x16xf32>
      %cst_49 = arith.constant dense<0xFF800000> : vector<16xf32>
      %142 = vector.multi_reduction <maximumf>, %141, %cst_49 [1] : vector<16x16xf32> to vector<16xf32>
      %143 = vector.shape_cast %142 : vector<16xf32> to vector<16x1xf32>
      %144 = arith.maximumf %arg20, %143 : vector<16x1xf32>
      %145 = arith.subf %arg20, %144 : vector<16x1xf32>
      %146 = math.exp %145 : vector<16x1xf32>
      %147 = vector.broadcast %144 : vector<16x1xf32> to vector<16x16xf32>
      %148 = arith.subf %141, %147 : vector<16x16xf32>
      %149 = math.exp %148 : vector<16x16xf32>
      %150 = vector.extract_strided_slice %15 {offsets = [0, 2], sizes = [16, 1], strides = [1, 1]} : vector<16x4xf32> to vector<16x1xf32>
      %151 = vector.extract_strided_slice %64 {offsets = [2, 0], sizes = [1, 16], strides = [1, 1]} : vector<4x16xf32> to vector<1x16xf32>
      %152 = vector.broadcast %150 : vector<16x1xf32> to vector<16x16xf32>
      %153 = vector.broadcast %151 : vector<1x16xf32> to vector<16x16xf32>
      %154 = arith.mulf %152, %153 : vector<16x16xf32>
      %cst_50 = arith.constant 0.000000e+00 : f32
      %cst_51 = arith.constant 1.000000e+00 : f32
      %155 = vector.broadcast %cst_50 : f32 to vector<16x16xf32>
      %156 = arith.maximumf %155, %154 : vector<16x16xf32>
      %157 = vector.broadcast %cst_51 : f32 to vector<16x16xf32>
      %158 = arith.minimumf %157, %156 : vector<16x16xf32>
      %159 = arith.mulf %146, %arg21 : vector<16x1xf32>
      %cst_52 = arith.constant dense<0.000000e+00> : vector<16xf32>
      %160 = vector.multi_reduction <add>, %149, %cst_52 [1] : vector<16x16xf32> to vector<16xf32>
      %161 = vector.shape_cast %160 : vector<16xf32> to vector<16x1xf32>
      %162 = arith.addf %159, %161 : vector<16x1xf32>
      %163 = arith.mulf %158, %149 : vector<16x16xf32>
      %164 = arith.truncf %163 : vector<16x16xf32> to vector<16x16xbf16>
      %cst_53 = arith.constant dense<0.000000e+00> : vector<16x8xf32>
      %165 = tpu.matmul %164, %137, %cst_53 {dimension_numbers = #tpu.dot_dimension_numbers<[1], [0], [0], [1], [0, 0, 1, 1], [], []>} : vector<16x16xbf16>, vector<16x8xbf16>, vector<16x8xf32> -> vector<16x8xf32>
      %166 = vector.broadcast %146 : vector<16x1xf32> to vector<16x8xf32>
      %167 = arith.mulf %166, %arg22 : vector<16x8xf32>
      %168 = arith.addf %167, %165 : vector<16x8xf32>
      %169 = vector.extract_strided_slice %58 {offsets = [0, 24], sizes = [16, 8], strides = [1, 1]} : vector<16x160xbf16> to vector<16x8xbf16>
      %170 = vector.extract_strided_slice %58 {offsets = [0, 152], sizes = [16, 8], strides = [1, 1]} : vector<16x160xbf16> to vector<16x8xbf16>
      %171 = vector.extract_strided_slice %14 {offsets = [0, 24], sizes = [16, 8], strides = [1, 1]} : vector<16x32xbf16> to vector<16x8xbf16>
      %cst_54 = arith.constant dense<0.000000e+00> : vector<16x16xf32>
      %172 = tpu.matmul %171, %169, %cst_54 {dimension_numbers = #tpu.dot_dimension_numbers<[1], [1], [0], [0], [0, 0, 1, 0], [], []>} : vector<16x8xbf16>, vector<16x8xbf16>, vector<16x16xf32> -> vector<16x16xf32>
      %173 = vector.broadcast %cst_14 : f32 to vector<16x16xf32>
      %174 = arith.select %69, %173, %172 : vector<16x16xi1>, vector<16x16xf32>
      %cst_55 = arith.constant dense<0xFF800000> : vector<16xf32>
      %175 = vector.multi_reduction <maximumf>, %174, %cst_55 [1] : vector<16x16xf32> to vector<16xf32>
      %176 = vector.shape_cast %175 : vector<16xf32> to vector<16x1xf32>
      %177 = arith.maximumf %arg23, %176 : vector<16x1xf32>
      %178 = arith.subf %arg23, %177 : vector<16x1xf32>
      %179 = math.exp %178 : vector<16x1xf32>
      %180 = vector.broadcast %177 : vector<16x1xf32> to vector<16x16xf32>
      %181 = arith.subf %174, %180 : vector<16x16xf32>
      %182 = math.exp %181 : vector<16x16xf32>
      %183 = vector.extract_strided_slice %15 {offsets = [0, 3], sizes = [16, 1], strides = [1, 1]} : vector<16x4xf32> to vector<16x1xf32>
      %184 = vector.extract_strided_slice %64 {offsets = [3, 0], sizes = [1, 16], strides = [1, 1]} : vector<4x16xf32> to vector<1x16xf32>
      %185 = vector.broadcast %183 : vector<16x1xf32> to vector<16x16xf32>
      %186 = vector.broadcast %184 : vector<1x16xf32> to vector<16x16xf32>
      %187 = arith.mulf %185, %186 : vector<16x16xf32>
      %cst_56 = arith.constant 0.000000e+00 : f32
      %cst_57 = arith.constant 1.000000e+00 : f32
      %188 = vector.broadcast %cst_56 : f32 to vector<16x16xf32>
      %189 = arith.maximumf %188, %187 : vector<16x16xf32>
      %190 = vector.broadcast %cst_57 : f32 to vector<16x16xf32>
      %191 = arith.minimumf %190, %189 : vector<16x16xf32>
      %192 = arith.mulf %179, %arg24 : vector<16x1xf32>
      %cst_58 = arith.constant dense<0.000000e+00> : vector<16xf32>
      %193 = vector.multi_reduction <add>, %182, %cst_58 [1] : vector<16x16xf32> to vector<16xf32>
      %194 = vector.shape_cast %193 : vector<16xf32> to vector<16x1xf32>
      %195 = arith.addf %192, %194 : vector<16x1xf32>
      %196 = arith.mulf %191, %182 : vector<16x16xf32>
      %197 = arith.truncf %196 : vector<16x16xf32> to vector<16x16xbf16>
      %cst_59 = arith.constant dense<0.000000e+00> : vector<16x8xf32>
      %198 = tpu.matmul %197, %170, %cst_59 {dimension_numbers = #tpu.dot_dimension_numbers<[1], [0], [0], [1], [0, 0, 1, 1], [], []>} : vector<16x16xbf16>, vector<16x8xbf16>, vector<16x8xf32> -> vector<16x8xf32>
      %199 = vector.broadcast %179 : vector<16x1xf32> to vector<16x8xf32>
      %200 = arith.mulf %199, %arg25 : vector<16x8xf32>
      %201 = arith.addf %200, %198 : vector<16x8xf32>
      scf.yield %78, %96, %102, %111, %129, %135, %144, %162, %168, %177, %195, %201 : vector<16x1xf32>, vector<16x1xf32>, vector<16x8xf32>, vector<16x1xf32>, vector<16x1xf32>, vector<16x8xf32>, vector<16x1xf32>, vector<16x1xf32>, vector<16x8xf32>, vector<16x1xf32>, vector<16x1xf32>, vector<16x8xf32>
    }
    %29 = tpu.reciprocal %28#1 {approx = true} : vector<16x1xf32> -> vector<16x1xf32>
    %30 = vector.broadcast %29 : vector<16x1xf32> to vector<16x8xf32>
    %31 = arith.mulf %28#2, %30 : vector<16x8xf32>
    %32 = arith.truncf %31 : vector<16x8xf32> to vector<16x8xbf16>
    %c0_17 = arith.constant 0 : index
    %c0_18 = arith.constant 0 : index
    %33 = vector.load %arg12[%c0_17, %c0_18] : memref<16x32xbf16, #tpu.memory_space<vmem>>, vector<16x8xbf16>
    tpu.vector_store %arg12[%c0_17, %c0_18], %32 {strides = array<i32>} : memref<16x32xbf16, #tpu.memory_space<vmem>>, vector<16x8xbf16>,
    %34 = tpu.reciprocal %28#4 {approx = true} : vector<16x1xf32> -> vector<16x1xf32>
    %35 = vector.broadcast %34 : vector<16x1xf32> to vector<16x8xf32>
    %36 = arith.mulf %28#5, %35 : vector<16x8xf32>
    %37 = arith.truncf %36 : vector<16x8xf32> to vector<16x8xbf16>
    %c0_19 = arith.constant 0 : index
    %c8 = arith.constant 8 : index
    %38 = vector.load %arg12[%c0_19, %c8] : memref<16x32xbf16, #tpu.memory_space<vmem>>, vector<16x8xbf16>
    tpu.vector_store %arg12[%c0_19, %c8], %37 {strides = array<i32>} : memref<16x32xbf16, #tpu.memory_space<vmem>>, vector<16x8xbf16>,
    %39 = tpu.reciprocal %28#7 {approx = true} : vector<16x1xf32> -> vector<16x1xf32>
    %40 = vector.broadcast %39 : vector<16x1xf32> to vector<16x8xf32>
    %41 = arith.mulf %28#8, %40 : vector<16x8xf32>
    %42 = arith.truncf %41 : vector<16x8xf32> to vector<16x8xbf16>
    %c0_20 = arith.constant 0 : index
    %c16 = arith.constant 16 : index
    %43 = vector.load %arg12[%c0_20, %c16] : memref<16x32xbf16, #tpu.memory_space<vmem>>, vector<16x8xbf16>
    tpu.vector_store %arg12[%c0_20, %c16], %42 {strides = array<i32>} : memref<16x32xbf16, #tpu.memory_space<vmem>>, vector<16x8xbf16>,
    %44 = tpu.reciprocal %28#10 {approx = true} : vector<16x1xf32> -> vector<16x1xf32>
    %45 = vector.broadcast %44 : vector<16x1xf32> to vector<16x8xf32>
    %46 = arith.mulf %28#11, %45 : vector<16x8xf32>
    %47 = arith.truncf %46 : vector<16x8xf32> to vector<16x8xbf16>
    %c0_21 = arith.constant 0 : index
    %c24 = arith.constant 24 : index
    %48 = vector.load %arg12[%c0_21, %c24] : memref<16x32xbf16, #tpu.memory_space<vmem>>, vector<16x8xbf16>
    tpu.vector_store %arg12[%c0_21, %c24], %47 {strides = array<i32>} : memref<16x32xbf16, #tpu.memory_space<vmem>>, vector<16x8xbf16>,
    %c0_22 = arith.constant 0 : index
    %c0_23 = arith.constant 0 : index
    %49 = vector.load %arg12[%c0_22, %c0_23] : memref<16x32xbf16, #tpu.memory_space<vmem>>, vector<16x32xbf16>
    %c0_24 = arith.constant 0 : index
    %c0_25 = arith.constant 0 : index
    %50 = vector.load %arg9[%c0_24, %c0_25] : memref<32x32xbf16, #tpu.memory_space<vmem>>, vector<32x32xbf16>
    %cst_26 = arith.constant dense<0.000000e+00> : vector<16x32xf32>
    %51 = tpu.matmul %49, %50, %cst_26 {dimension_numbers = #tpu.dot_dimension_numbers<[1], [0], [0], [1], [0, 0, 1, 1], [], []>} : vector<16x32xbf16>, vector<32x32xbf16>, vector<16x32xf32> -> vector<16x32xf32>
    %c0_27 = arith.constant 0 : index
    %c0_28 = arith.constant 0 : index
    %c0_29 = arith.constant 0 : index
    %52 = vector.load %arg10[%c0_27, %c0_28, %c0_29] : memref<1x16x32xf32, #tpu.memory_space<vmem>>, vector<1x16x32xf32>
    %53 = vector.shape_cast %52 : vector<1x16x32xf32> to vector<16x32xf32>
    %54 = vector.shape_cast %51 : vector<16x32xf32> to vector<1x16x32xf32>
    tpu.vector_store %arg10[%c0_27, %c0_28, %c0_29], %54 {strides = array<i32>} : memref<1x16x32xf32, #tpu.memory_space<vmem>>, vector<1x16x32xf32>,
    return
  }
  func.func @transform_0(%arg0: i32, %arg1: i32) -> (i32, i32, i32) {
    %c0_i32 = arith.constant 0 : i32
    %c0_i32_0 = arith.constant 0 : i32
    %c0_i32_1 = arith.constant 0 : i32
    return %arg0, %c0_i32, %c0_i32_0 : i32, i32, i32
  }
  func.func @transform_1(%arg0: i32, %arg1: i32) -> (i32, i32) {
    %c0_i32 = arith.constant 0 : i32
    %c0_i32_0 = arith.constant 0 : i32
    %c0_i32_1 = arith.constant 0 : i32
    return %c0_i32, %c0_i32_0 : i32, i32
  }
  func.func @transform_2(%arg0: i32, %arg1: i32) -> (i32, i32) {
    %c0_i32 = arith.constant 0 : i32
    %c0_i32_0 = arith.constant 0 : i32
    %c0_i32_1 = arith.constant 0 : i32
    return %c0_i32, %c0_i32_0 : i32, i32
  }
  func.func @transform_3(%arg0: i32, %arg1: i32) -> (i32, i32) {
    %c0_i32 = arith.constant 0 : i32
    %c0_i32_0 = arith.constant 0 : i32
    %c0_i32_1 = arith.constant 0 : i32
    return %c0_i32, %c0_i32_0 : i32, i32
  }
  func.func @transform_4(%arg0: i32, %arg1: i32) -> (i32, i32) {
    %c0_i32 = arith.constant 0 : i32
    %c0_i32_0 = arith.constant 0 : i32
    %c0_i32_1 = arith.constant 0 : i32
    return %c0_i32, %c0_i32_0 : i32, i32
  }
  func.func @transform_5(%arg0: i32, %arg1: i32) -> (i32, i32) {
    %c0_i32 = arith.constant 0 : i32
    %c0_i32_0 = arith.constant 0 : i32
    %c0_i32_1 = arith.constant 0 : i32
    return %c0_i32, %c0_i32_0 : i32, i32
  }
  func.func @transform_6(%arg0: i32, %arg1: i32) -> (i32, i32) {
    %c0_i32 = arith.constant 0 : i32
    %c0_i32_0 = arith.constant 0 : i32
    %c0_i32_1 = arith.constant 0 : i32
    return %c0_i32, %c0_i32_0 : i32, i32
  }
  func.func @transform_7(%arg0: i32, %arg1: i32) -> (i32, i32) {
    %c0_i32 = arith.constant 0 : i32
    %c0_i32_0 = arith.constant 0 : i32
    %c0_i32_1 = arith.constant 0 : i32
    return %c0_i32, %c0_i32_0 : i32, i32
  }
  func.func @transform_8(%arg0: i32, %arg1: i32) -> (i32, i32, i32) {
    %c0_i32 = arith.constant 0 : i32
    %c0_i32_0 = arith.constant 0 : i32
    return %arg0, %arg1, %c0_i32 : i32, i32, i32
  }
}

</mosaic_0001>

<bundles_post_ra>
// kernel: tpu_custom_call.1
= control target key start
LH: loop header
LB: loop body
LE: loop exit
PB: predicated region body
PF: predicated region fallthrough
CT: control target
= control target key end

     0   :  { %s2957_s0 = inlined_call_operand.vmem [shape: bf16[2,16,32], index: 0, kind: input, shape index: {}]   ;;  %s2958_s1 = inlined_call_operand.hbm [shape: bf16[32,132], index: 1, kind: input, shape index: {}]   ;;  %s2959_s2 = inlined_call_operand.vmem [shape: f32[1,132], index: 2, kind: input, shape index: {}]   ;;  %s2960_s3 = inlined_call_operand.hbm [shape: bf16[32,160], index: 3, kind: input, shape index: {}]   ;;  %s2961_s4 = inlined_call_operand.vmem [shape: f32[1,160], index: 4, kind: input, shape index: {}]   ;;  %s2962_s5 = inlined_call_operand.vmem [shape: bf16[32,4], index: 5, kind: input, shape index: {}]   ;;  %s2963_s6 = inlined_call_operand.vmem [shape: f32[4,1], index: 6, kind: input, shape index: {}]   ;;  %s2964_s7 = inlined_call_operand.hbm [shape: bf16[32,32], index: 7, kind: input, shape index: {}]   ;;  %s2965_s8 = inlined_call_operand.hbm [shape: f32[2,16,32], index: 8, kind: output, shape index: {}]  }
   0x1   :  { %2971 = sst [smem:[#allocation24_spill]] %s2960_s3 }
   0x2   :  { %13 = vsyncpa [#allocation5], 0 }
   0x3   :  { %14 = vsyncpa [#allocation8], 0 }
   0x4   :  { %15 = vsyncpa [#allocation6], 0 }
   0x5   :  { %17 = vsyncpa [#allocation6 + $0x1], 0  ;;  %s2286_s27 = smov 0   ;;  %s2288_s28 = smov 0  }
   0x6   :  { %s2290_s29 = smov 0   ;;  %s2292_s30 = smov 0  }
   0x7   :  { %s2294_s9 = smov 0   ;;  %s2296_s10 = smov 0  }
   0x8 LB: > { %2972 = sst [smem:[#allocation14_spill]] %s2109_s29  ;;  %s1356_s11 = sadd.s32 4294967295, %s2121_s10   ;;  %s2121_s10 = sphi %s2296_s10, %s23_s10   ;;  %s2117_s9 = sphi %s2294_s9, %s3039_s9   ;;  %s2113_s30 = sphi %s2292_s30, %s3035_s30   ;;  %s2109_s29 = sphi %s2290_s29, %s3034_s29   ;;  %s2105_s28 = sphi %s2288_s28, %s3038_s28   ;;  %s2101_s27 = sphi %s2286_s27, %s3037_s27  }
   0x9   : > { %2973 = sst [smem:[#allocation15_spill]] %s2117_s9  ;;  %s1357_s12 = sadd.s32 4294967294, %s2121_s10  }
   0xa   : > { %s35_s13 = sadd.s32 1, %s2117_s9  ;;  %s217_s14 = sadd.s32 1, %s2109_s29 }
   0xb   : > { %p37_p0 = scmp.ge.s32.totalorder %s35_s13, 2  ;;  %p227_p1 = scmp.ne.s32.totalorder %s2109_s29, %s2105_s28 }
   0xc   : > { %p228_p2 = scmp.eq.s32.totalorder %s1356_s11, 1  ;;  %p233_p3 = scmp.ne.s32.totalorder %s2105_s28, %s2101_s27 }
   0xd   : > { %s3041_s13 = smov (%p37_p0, %s35_s13), 0  ;;  %p234_p5 = scmp.eq.s32.totalorder %s1357_s12, 1 }
   0xe   : > { %2974 = sst [smem:[#allocation16_spill]] %s3041_s13  ;;  %p2326_p4 = por %p228_p2, %p227_p1 }
   0xf   : > { %s212_s16 = ssub.s32 %s2117_s9, %s3041_s13  ;;  %p1358_p6 = scmp.ge.s32.totalorder %s2121_s10, 1 }
  0x10   : > { %p215_p7 = scmp.eq.s32.totalorder %s212_s16, 0  ;;  %p2333_p8 = por %p234_p5, %p233_p3 }
  0x11   : > { %p241_p9 = scmp.lt.s32.totalorder %s2121_s10, 3  ;;  %p2345_p11 = scmp.eq.s32.totalorder %s1356_s11, 0 }
  0x12   : > { %s2976_s17 = scalar_select %p2333_p8, 1, 0 }
  0x13   : > { %s2339_s18 = scalar_select %p215_p7, %s2109_s29, %s217_s14  }
  0x14   : > { %2977 = sst [smem:[#allocation17_spill]] %s2976_s17  ;;  %p2341_p10 = pnand %p1358_p6, %p241_p9 }
  0x15   : > { %2978 = sst [smem:[#allocation18_spill]] %s2339_s18  ;;  %s2223_s25 = smov [#allocation7]  }
  0x16   : > { %p1500_p12 = pneg %p2341_p10  ;;  %s2981_s3 = sld [smem:[#allocation24_spill]] }
  0x17   : > { %s271_s26 = sshll.u32 %s2223_s25, 4  ;;  %s2224_s11 = smov 128   ;;  %s272_s26 = int_to_ptr.vmem [resolvable:$true] %s271_s26 }
  0x18   : > { %p2356_p13 = pnand %p2345_p11, %p1500_p12  ;;  %s2225_s12 = smov 8  }
  0x19   : > { %s252_s21 = sshll.u32 %s2958_s1, 4  ;;  %s2226_s22 = smov [#allocation4]   ;;  %s253_s21 = int_to_ptr.hbm [resolvable:$true] %s252_s21 }
  0x1a   : > { %s292_s18 = sshll.u32 %s2964_s7, 4  ;;  %s2227_s25 = smov [#allocation9]   ;;  %s293_s18 = int_to_ptr.hbm [resolvable:$true] %s292_s18 }
  0x1b   : > { %s294_s29 = sshll.u32 %s2227_s25, 4  ;;  %s2228_s17 = smov 64   ;;  %s295_s29 = int_to_ptr.vmem [resolvable:$true] %s294_s29 }
  0x1c   : > { %s269_s23 = sshll.u32 %s2981_s3, 4  ;;  %s254_s3 = sshll.u32 %s2226_s22, 4  ;;  %s270_s23 = int_to_ptr.hbm [resolvable:$true] %s269_s23  ;;  %s255_s3 = int_to_ptr.vmem [resolvable:$true] %s254_s3 }
  0x1d   : > { %1506 = dma.hbm_to_vmem [thread:$0]  (!%p2356_p13), %s270_s23, 512, %s272_s26, [#allocation8], %s2224_s11, %s2224_s11, %s2225_s12  }
  0x1e   : > { %1503 = dma.hbm_to_vmem [thread:$0]  (!%p2356_p13), %s253_s21, 512, %s255_s3, [#allocation5], %s2224_s11, %s2224_s11, %s2225_s12  }
  0x1f   : > { %s2229_s23 = smov 4   ;;  %318 = sbr.rel (%p2341_p10) target bundleno = 1125 (0x465), region = 52 }
  0x20   : > { %1509 = dma.hbm_to_vmem [thread:$0]  (!%p2356_p13), %s293_s18, 256, %s295_s29, [#allocation8], %s2228_s17, %s2228_s17, %s2229_s23  }
  0x24   : > { %2088 = dma.done.wait (%p2345_p11), [#allocation5], 512  }
  0x25   : > { %2090 = vsyncadd (%p2345_p11), [#allocation5], 4294966784 }
  0x26   : > { %2092 = dma.done.wait (%p2345_p11), [#allocation8], 768  }
  0x27   : > { %2094 = vsyncadd (%p2345_p11), [#allocation8], 4294966528  ;;  %s360_s3 = sand.u32 1, %s2105_s28   ;;  %p363_p0 = scmp.lt.s32.totalorder %s2113_s30, 1  ;;  %v2392_v0 = vld [vmem:[%s2962_s5] sm:$0xf]  ;;  %v2970_v31 = vlaneseq }
  0x28   : > { %s2386_s29 = sshll.u32 %s360_s3, 4  ;;  %2983 = vst [vmem:[#allocation19_spill] sm:$0xff] %v2392_v0  ;;  %v2397_v1 = vld [vmem:[%s2962_s5] sm:$0xf0]  ;;  %v2402_v2 = vld [vmem:[%s2962_s5 + $0x8] sm:$0xf] }
  0x29   : > { %s364_s9 = scalar_select %p363_p0, %s2113_s30, 1  ;;  %2984 = vst [vmem:[#allocation20_spill] sm:$0xff] %v2397_v1  ;;  %v2407_v3 = vld [vmem:[%s2962_s5 + $0x8] sm:$0xf0]  ;;  %v2412_v4 = vld [vmem:[%s2963_s6] sm:$0xf] }
  0x2a   : > { %2985 = vst [vmem:[#allocation21_spill] sm:$0xff] %v2402_v2  ;;  %v1384_v5 = vld [vmem:[#allocation7 + $0x10] sm:$0xf]  ;;  %v1470_v6 = vld [vmem:[#allocation7 + $0x14] sm:$0xf0]  ;;  %vm411_vm0 = vcmask 261120  }
  0x2b   : > { %s1465_s13 = sshll.u32 %s364_s9, 3  ;;  %2986 = vst [vmem:[#allocation22_spill] sm:$0xff] %v2407_v3  ;;  %v1469_v7 = vld [vmem:[#allocation7 + $0x14] sm:$0xf]  ;;  %v1386_v8 = vld [vmem:[#allocation7 + $0x18] sm:$0xf0]  ;;  %v1385_v9 = vor.u32 %v1470_v6, %v1384_v5 }
  0x2c   : > { %2987 = vst [vmem:[#allocation23_spill] sm:$0xff] %v2412_v4  ;;  %v1389_v10 = vor.u32 %v1469_v7, %v1386_v8  ;;  %v1406_v11 = vld [vmem:[#allocation4 + $0x10] sm:$0xf]  ;;  %v1475_v12 = vld [vmem:[#allocation4 + $0x14] sm:$0xf0]  ;;  %s2417_s25 = scalar_lea.vmem %s2957_s0, %s1465_s13  ;;  %v2426_v32 = vshrl.u32 %v2970_v31, 7 }
  0x2d   : > { %v1474_v13 = vld [vmem:[#allocation4 + $0x14] sm:$0xf]  ;;  %v1407_v14 = vor.u32 %v1475_v12, %v1406_v11  ;;  %v1408_v15 = vld [vmem:[#allocation4 + $0x18] sm:$0xf0]  ;;  %v1376_v16 = vld [vmem:[#allocation7] sm:$0xf]  ;;  %421 = vmatpush.bf16.msra.mxu0 %v1385_v9 }
  0x2e   : > { %v1468_v17 = vld [vmem:[#allocation7 + $0x4] sm:$0xf0]  ;;  %435 = vmatpush.bf16.msra.mxu1 %v1389_v10  ;;  %v1411_v18 = vor.u32 %v1474_v13, %v1408_v15  ;;  %v1467_v20 = vld [vmem:[#allocation7 + $0x4] sm:$0xf]  ;;  %v1378_v21 = vld [vmem:[#allocation7 + $0x8] sm:$0xf0] }
  0x2f   : > { %v1377_v19 = vor.u32 %v1468_v17, %v1376_v16  ;;  %v1398_v22 = vld [vmem:[#allocation4] sm:$0xf]  ;;  %505 = vmatpush.bf16.msra.mxu2 %v1407_v14  ;;  %v1381_v23 = vor.u32 %v1467_v20, %v1378_v21  ;;  %v1473_v24 = vld [vmem:[#allocation4 + $0x4] sm:$0xf0]  ;;  %v1472_v25 = vld [vmem:[#allocation4 + $0x4] sm:$0xf] }
  0x30   : > { %v1400_v26 = vld [vmem:[#allocation4 + $0x8] sm:$0xf0]  ;;  %519 = vmatpush.bf16.msra.mxu3 %v1411_v18  ;;  %v1399_v27 = vor.u32 %v1473_v24, %v1398_v22  ;;  %v2429_v33 = vadd.s32 8, %v2426_v32  ;;  %v380_v34 = vld [vmem:[%s2961_s4] sm:$0x3]  ;;  %vm448_vm1 = vcmask 1043456  }
  0x31   : > { %v1403_v28 = vor.u32 %v1472_v25, %v1400_v26  ;;  %v1466_v29 = vld [vmem:[%s2417_s25] sm:$0xff]  ;;  %422 = vmatpush.bf16.msra.mxu0 %v1377_v19  ;;  %v382_v35 = vperm.slane %v380_v34, 0  ;;  %v383_v36 = vperm.slane %v380_v34, 1  ;;  %vm449_vm2 = vcmask 261124   ;;  %s2450_s18 = scalar_lea.vmem [#allocation10], %s2386_s29  ;;  %s2500_s29 = smov 0  }
  0x32   : > { %436 = vmatpush.bf16.msra.mxu1 %v1381_v23  ;;  %v1471_v30 = vld [vmem:[%s2417_s25] sm:$0xff]  ;;  %vm450_vm3 = vmor %vm449_vm2, %vm448_vm1  ;;  %v2452_v60 = vmov 0.0   ;;  %v2454_v61 = vmov 0.0   ;;  %v2456_v62 = vmov 0.0   ;;  %v2458_v63 = vmov 0.0  }
  0x33   : > { %506 = vmatpush.bf16.msra.mxu2 %v1399_v27  ;;  %v464_v41 = vld [vmem:[%s2959_s2] sm:$0x3]  ;;  %v2460_v5 = vmov -1e+30   ;;  %v2462_v6 = vmov -1e+30  }
  0x34   : > { %520 = vmatpush.bf16.msra.mxu3 %v1403_v28  ;;  %1390 = vmatmul.msk.bf16.vlgmr.msra.gmra.mxu0 %vm411_vm0, %v1466_v29  ;;  %v466_v43 = vperm.slane %v464_v41, 0  ;;  %v467_v44 = vperm.slane %v464_v41, 1  ;;  %v2464_v7 = vmov 0.0   ;;  %v2466_v8 = vmov 0.0  }
  0x35   : > { %1391 = vmatmul.msk.bf16.vlgmr.msra.gmra.mxu1 %vm411_vm0, %v1466_v29  ;;  %v2468_v9 = vmov 0.0   ;;  %v2470_v10 = vmov 0.0   ;;  %v2472_v11 = vmov -1e+30   ;;  %v2474_v12 = vmov -1e+30  }
  0x36   : > { %1412 = vmatmul.msk.bf16.vlgmr.msra.gmra.mxu2 %vm411_vm0, %v1471_v30  ;;  %v2476_v13 = vmov 0.0   ;;  %v2478_v14 = vmov 0.0   ;;  %v2480_v15 = vmov 0.0   ;;  %v2482_v16 = vmov 0.0  }
  0x37   : > { %1413 = vmatmul.msk.bf16.vlgmr.msra.gmra.mxu3 %vm411_vm0, %v1471_v30  ;;  %v2484_v17 = vmov -1e+30   ;;  %v2486_v18 = vmov -1e+30   ;;  %v2488_v19 = vmov 0.0   ;;  %v2490_v20 = vmov 0.0  }
  0x38   : > { %v2492_v21 = vmov 0.0   ;;  %v2494_v22 = vmov 0.0   ;;  %v2496_v23 = vmov -1e+30   ;;  %v2498_v24 = vmov -1e+30  }
  0xb1   : > { %v424_v37 = vpop.f32.mrf.mxu0 }
  0xb2   : > { %v438_v38 = vpop.f32.mrf.mxu1  ;;  %v425_v39 = vadd.f32 %v424_v37, %v382_v35 }
  0xb3   : > { %v439_v40 = vadd.f32 %v438_v38, %v383_v36 }
  0xb5   : > { %v443_v42 = vpack.c.bf16 %v439_v40, %v425_v39 }
  0xb7   : > { %451 = vst.msk [vmem:[#allocation2] sm:$0xff] %vm450_vm3, %v443_v42 }
  0xb9   : > { %v508_v45 = vpop.f32.mrf.mxu2  ;;  %v426_v48 = vpop.f32.mrf.mxu0 }
  0xba   : > { %v2437_v46 = vadd.f32 %v508_v45, %v466_v43  ;;  %v522_v47 = vpop.f32.mrf.mxu3  ;;  %v427_v50 = vadd.f32 %v426_v48, %v382_v35  ;;  %v440_v51 = vpop.f32.mrf.mxu1 }
  0xbb   : > { %v2439_v49 = vadd.f32 %v522_v47, %v467_v44  ;;  %v441_v53 = vadd.f32 %v440_v51, %v383_v36 }
  0xbd   : > { %v444_v54 = vpack.c.bf16 %v441_v53, %v427_v50 }
  0xbf   : > { %452 = vst.msk [vmem:[#allocation2 + $0x8] sm:$0xff] %vm450_vm3, %v444_v54 }
  0xc1   : > { %v510_v55 = vpop.f32.mrf.mxu2 }
  0xc2   : > { %v2443_v56 = vadd.f32 %v510_v55, %v466_v43  ;;  %v524_v57 = vpop.f32.mrf.mxu3 }
  0xc3   : > { %v2445_v58 = vadd.f32 %v524_v57, %v467_v44 }
  0xc4 LB: >> { %s2578_s19 = sshll.u32 %s2221_s29, 4  ;;  %s2230_s20 = smov 120   ;;  %v2988_v52 = vpack.c.bf16 %v2437_v46, %v2437_v46  ;;  %v2989_v59 = vpack.c.bf16 %v2443_v56, %v2443_v56  ;;  %vm656_vm4 = vcmask 64512   ;;  %v2990_v0 = vld [vmem:[#allocation19_spill] sm:$0xff]  ;;  %v2991_v1 = vld [vmem:[#allocation20_spill] sm:$0xff]  ;;  %v2992_v2 = vld [vmem:[#allocation21_spill] sm:$0xff]  ;;  %v2995_v31 = vlaneseq  ;;  %s2221_s29 = sphi %s2500_s29, %s544_s29   ;;  %v2217_v24 = vphi %v2498_v24, %v3031_v24   ;;  %v2213_v23 = vphi %v2496_v23, %v3030_v23   ;;  %v2209_v22 = vphi %v2494_v22, %v3029_v22   ;;  %v2205_v21 = vphi %v2492_v21, %v3028_v21   ;;  %v2201_v20 = vphi %v2490_v20, %v3027_v20   ;;  %v2197_v19 = vphi %v2488_v19, %v3026_v19   ;;  %v2193_v18 = vphi %v2486_v18, %v3025_v18   ;;  %v2189_v17 = vphi %v2484_v17, %v3024_v17   ;;  %v2185_v16 = vphi %v2482_v16, %v3023_v16   ;;  %v2181_v15 = vphi %v2480_v15, %v3022_v15   ;;  %v2177_v14 = vphi %v2478_v14, %v3021_v14   ;;  %v2173_v13 = vphi %v2476_v13, %v3020_v13   ;;  %v2169_v12 = vphi %v2474_v12, %v3019_v12   ;;  %v2165_v11 = vphi %v2472_v11, %v3018_v11   ;;  %v2161_v10 = vphi %v2470_v10, %v3017_v10   ;;  %v2157_v9 = vphi %v2468_v9, %v3016_v9   ;;  %v2153_v8 = vphi %v2466_v8, %v3015_v8   ;;  %v2149_v7 = vphi %v2464_v7, %v3014_v7   ;;  %v2145_v6 = vphi %v2462_v6, %v3013_v6   ;;  %v2141_v5 = vphi %v2460_v5, %v3012_v5   ;;  %v2137_v63 = vphi %v2458_v63, %v3011_v63   ;;  %v2133_v62 = vphi %v2456_v62, %v3010_v62   ;;  %v2129_v61 = vphi %v2454_v61, %v3009_v61   ;;  %v2125_v60 = vphi %v2452_v60, %v3008_v60  }
  0xc5   : >> { %s576_s24 = scalar_lea.vmem [#allocation2], %s2578_s19  ;;  %s2231_s26 = smov 104   ;;  %v1421_v35 = vor.u32 %v2991_v1, %v2990_v0  ;;  %v2993_v3 = vld [vmem:[#allocation22_spill] sm:$0xff]  ;;  %v2233_v38 = vmov 0   ;;  %v2994_v4 = vld [vmem:[#allocation23_spill] sm:$0xff]  ;;  %v2234_v45 = vmov 1  }
  0xc6   : >> { %v1433_v25 = vld [vmem:[%s576_s24] sm:$0xf]  ;;  %v1480_v26 = vld [vmem:[%s576_s24 + $0x4] sm:$0xf0]  ;;  %v648_v28 = vunpack.c.l.b16 %v2988_v52  ;;  %v649_v29 = vunpack.c.l.b16 %v2989_v59  ;;  %s2232_s11 = smov 112   ;;  %v1425_v36 = vor.u32 %v2993_v3, %v2992_v2  ;;  %1787 = vset.pattern.permute.xlu1 %v2233_v38  ;;  %1788 = vset.pattern.permute.xlu2 %v2233_v38  ;;  %s572_s12 = sshra.s32 %s2578_s19, 3 }
  0xc7   : >> { %v1434_v27 = vor.u32 %v1480_v26, %v1433_v25  ;;  %v1479_v37 = vld [vmem:[%s576_s24 + $0x4] sm:$0xf]  ;;  %v1436_v39 = vld [vmem:[%s576_s24 + $0x8] sm:$0xf0]  ;;  %s1417_s14 = sshll.u32 %s572_s12, 2  ;;  %v2235_v48 = vmov 3   ;;  %v642_v25 = vstv %s2578_s19 }
  0xc8   : >> { %v650_v30 = vpack.c.b16 %v649_v29, %v648_v28  ;;  %v2601_v40 = vor.u32 %v1479_v37, %v1436_v39  ;;  %s580_s16 = scalar_lea.vmem %s2417_s25, %s1417_s14  ;;  %v2236_v53 = vmov 2   ;;  %v641_v57 = vand.u32 127, %v2995_v31  ;;  %s544_s29 = sadd.s32 1, %s2221_s29  }
  0xc9   : >> { %757 = vrot.lane.b32.xlu0 %v1434_v27, %s2230_s20  ;;  %953 = vrot.lane.b32.xlu1 %v1434_v27, %s2231_s26  ;;  %v661_v34 = vsel %vm656_vm4, %v1434_v27, 0  ;;  %v1481_v50 = vld [vmem:[%s580_s16] sm:$0xff]  ;;  %vm679_vm7 = vcmask 130048   ;;  %p2830_p1 = scmp.ge.s32.totalorder %s544_s29, 1 }
  0xca   : >> { %855 = vrot.lane.b32.xlu2 %v1434_v27, %s2232_s11  ;;  %670 = vmatpush.bf16.xpose.msra.mxu1 %v661_v34  ;;  %v625_v51 = vsel %vm411_vm0, %v1481_v50, 0  ;;  %v2621_v26 = vadd.s32 %v642_v25, %v641_v57  ;;  %s2237_s22 = smov (%p2830_p1), 8   ;;  %s2238_s25 = smov (%p2830_p1), 16   ;;  %vm1055_vm8 = vcmask (%p2830_p1), 60416   ;;  %vm1072_vm9 = vcmask (%p2830_p1), 126016  }
  0xcb   : >> { %744 = vmatpush.bf16.msra.mxu2 %v2601_v40  ;;  %634 = vmatpush.bf16.xpose.msra.mxu0 %v625_v51  ;;  %s2239_s23 = smov (%p2830_p1), 24   ;;  %vm1089_vm10 = vcmask (%p2830_p1), 191616   ;;  %vm1106_vm11 = vcmask (%p2830_p1), 257216   ;;  %s1485_s9 = sshll.u32 (%p2830_p1), %s2113_s30, 4 }
  0xcc   : >> { %vm644_vm5 = vcmp.gt.s32.totalorder %v2621_v26, %v2426_v32  ;;  %vm645_vm6 = vcmp.gt.s32.totalorder %v2621_v26, %v2429_v33  ;;  %s1165_s29 = scalar_lea.hbm (%p2830_p1), %s2965_s8, %s1485_s9  ;;  %s1166_s19 = sshll.u32 (%p2830_p1), %s2450_s18, 4  ;;  %s1167_s19 = int_to_ptr.vmem [resolvable:$true] %s1166_s19 }
  0xcd   : > { %s1168_s24 = sshll.u32 (%p2830_p1), %s1165_s29, 4  ;;  %s1955_s14 = scalar_lea.hbm (%p2830_p1), %s2965_s8, 32  ;;  %s1169_s24 = int_to_ptr.hbm [resolvable:$true] %s1168_s24 }
  0xd1   : >> { %755 = vrot.lane.b32.xlu0 %v650_v30, %s2230_s20  ;;  %951 = vrot.lane.b32.xlu1 %v650_v30, %s2231_s26 }
  0xd2   : >> { %853 = vrot.lane.b32.xlu2 %v650_v30, %s2232_s11  ;;  %1435 = vmatmul.msk.bf16.vlgmr.msra.gmra.mxu1 %vm656_vm4, %v650_v30 }
  0xd9   : >> { %585 = vperm.xlu1 %1787, %v2994_v4  }
  0xda   : >> { %702 = vperm.xlu2 %1788, %v2439_v49  }
  0xe1   : >> { %1791 = vset.pattern.permute.xlu1 %v2234_v45 }
  0xe2   : >> { %806 = vperm.xlu1 %1791, %v2445_v58   ;;  %1790 = vset.pattern.permute.xlu2 %v2234_v45 }
  0xe3   : >> { %802 = vperm.xlu2 %1790, %v2439_v49  }
  0xea   : >> { %1792 = vset.pattern.permute.xlu1 %v2235_v48 }
  0xeb   : >> { %998 = vperm.xlu1 %1792, %v2439_v49   ;;  %829 = vrot.lane.b32.xlu2 %v2601_v40, %s2230_s20  ;;  %s1152_s20 = scalar_lea.sflag (%p2830_p1), [#allocation6], %s360_s3 }
  0xec   : >> { %1793 = vset.pattern.permute.xlu2 %v2235_v48 }
  0xf3   : >> { %600 = vxpose.xlu0.c.b16.start [1/2] (short) (narrow) %v1421_v35, 16  ;;  %1794 = vset.pattern.permute.xlu1 %v2236_v53 }
  0xf4   : >> { %1002 = vperm.xlu2 %1793, %v2445_v58   ;;  %900 = vperm.xlu1 %1794, %v2439_v49  }
 0x103   : >> { %601 = vxpose.xlu0.c.b16.end [2/2] (short) (narrow) %v1425_v36, 16 }
 0x124   : >> { %v856_v35 = vpop.permute.xlu2 %855 }
 0x125   : >> { %v861_v36 = vsel %vm656_vm4, %v856_v35, 0 }
 0x126   : >> { %870 = vmatpush.bf16.xpose.msrb.mxu0 %v861_v36 }
 0x13b   : >> { %v758_v41 = vpop.permute.xlu0 %757  ;;  %v954_v42 = vpop.permute.xlu1 %953 }
 0x13c   : >> { %v763_v43 = vsel %vm656_vm4, %v758_v41, 0  ;;  %v959_v44 = vsel %vm656_vm4, %v954_v42, 0 }
 0x13d   : >> { %772 = vmatpush.bf16.xpose.msra.mxu3 %v763_v43 }
 0x143   : >> { %v756_v47 = vpop.permute.xlu0 %755  ;;  %v952_v54 = vpop.permute.xlu1 %951 }
 0x144   : >> { %1441 = vmatmul.msk.bf16.vlgmr.msra.gmra.mxu3 %vm656_vm4, %v756_v47 }
 0x145   : >> { %968 = vmatpush.bf16.xpose.msrb.mxu3 %v959_v44 }
 0x14b   : >> { %v586_v44 = vpop.permute.xlu1 %585 }
 0x14f   : >> { %v672_v55 = vpop.f32.mrf.mxu1 }
 0x150   : >> { %v677_v28 = vsel %vm644_vm5, -1e+30, %v672_v55 }
 0x151   : >> { %v680_v34 = vsel %vm679_vm7, %v677_v28, -inf }
 0x152   : >> { %681 = vmax.xlane.f32.xlu2 %v680_v34 }
 0x154   : >> { %1445 = vmatmul.msk.bf16.vlgmr.msrb.gmra.mxu3 %vm656_vm4, %v952_v54  ;;  %v2655_v51 = vpop.permute.xlu1 %806 }
 0x157   : >> { %v674_v27 = vpop.f32.mrf.mxu1 }
 0x158   : >> { %v678_v29 = vsel %vm645_vm6, -1e+30, %v674_v27 }
 0x159   : >> { %v683_v30 = vsel %vm679_vm7, %v678_v29, -inf }
 0x15a   : >> { %684 = vmax.xlane.f32.xlu1 %v683_v30 }
 0x15d   : >> { %v999_v25 = vpop.permute.xlu1 %998 }
 0x166   : >> { %v901_v30 = vpop.permute.xlu1 %900 }
 0x16a   : >> { %1789 = vset.pattern.permute.xlu0 %v2233_v38  ;;  %v854_v38 = vpop.permute.xlu2 %853 }
 0x171   : >> { %707 = vperm.xlu0 %1789, %v2445_v58  }
 0x172   : >> { %v703_v41 = vpop.permute.xlu2 %702 }
 0x179   : >> { %1795 = vset.pattern.permute.xlu0 %v2236_v53 }
 0x17a   : >> { %904 = vperm.xlu0 %1795, %v2445_v58   ;;  %v2653_v50 = vpop.permute.xlu2 %802 }
 0x182   : >> { %1796 = vset.pattern.permute.xlu0 %v2235_v48  ;;  %v830_v54 = vpop.permute.xlu2 %829 }
 0x183   : >> { %842 = vmatpush.bf16.msrb.mxu2 %v830_v54 }
 0x18a   : >> { %v1003_v34 = vpop.permute.xlu2 %1002 }
 0x19f   : >> { %v608_v37 = vpop.trf.xlu0 }
 0x1a0   : >> { %1430 = vmatmul.msk.bf16.vlgmr.msra.gmra.mxu0 %vm411_vm0, %v608_v37 }
 0x1b0   : >> { %1443 = vmatmul.msk.bf16.vlgmr.msrb.gmra.mxu0 %vm656_vm4, %v854_v38 }
 0x1c5   : >> { %v682_v36 = vpop.xlane.xlu2 %681 }
 0x1c6   : >> { %v2668_v38 = vmax.f32 %v2217_v24, %v682_v36  }
 0x1c7   : >> { %v774_v39 = vpop.f32.mrf.mxu3 }
 0x1c8   : >> { %v2642_v42 = vsel %vm644_vm5, -1e+30, %v774_v39  ;;  %v694_v54 = vsub.f32 %v677_v28, %v2668_v38 }
 0x1c9   : >> { %v781_v43 = vsel %vm679_vm7, %v2642_v42, -inf }
 0x1ca   : >> { %782 = vmax.xlane.f32.xlu1 %v781_v43 }
 0x1cd   : >> { %v685_v35 = vpop.xlane.xlu1 %684 }
 0x1ce   : >> { %v2665_v37 = vmax.f32 %v2213_v23, %v685_v35  }
 0x1cf   : >> { %v776_v45 = vpop.f32.mrf.mxu3 }
 0x1d0   : >> { %v2649_v47 = vsel %vm645_vm6, -1e+30, %v776_v45  ;;  %v695_v45 = vsub.f32 %v678_v29, %v2665_v37 }
 0x1d1   : >> { %v784_v48 = vsel %vm679_vm7, %v2649_v47, -inf }
 0x1d2   : >> { %785 = vmax.xlane.f32.xlu1 %v784_v48  ;;  %v698_v48 = vmul.f32 1.442695, %v695_v45 }
 0x1d4   : >> { %1797 = vpow2.f32 %v698_v48 }
 0x1d7   : >> { %v970_v53 = vpop.f32.mrf.mxu3 }
 0x1da   : >> { %v1798_v59 = vpop.eup %1797 }
 0x1df   : >> { %v972_v55 = vpop.f32.mrf.mxu3 }
 0x1e0   : >> { %v2660_v57 = vsel %vm645_vm6, -1e+30, %v972_v55 }
 0x1e1   : >> { %v980_v27 = vsel %vm679_vm7, %v2660_v57, -inf }
 0x1e2   : >> { %981 = vmax.xlane.f32.xlu1 %v980_v27  ;;  %v696_v27 = vmul.f32 1.442695, %v694_v54 }
 0x1e3   : >> { %v708_v43 = vpop.permute.xlu0 %707 }
 0x1e4   : >> { %1799 = vpow2.f32 %v696_v27 }
 0x1ea   : >> { %v1800_v3 = vpop.eup %1799 }
 0x1fb   : >> { %927 = vrot.lane.b32.xlu1 %v2601_v40, %s2232_s11 }
 0x21d   : >> { %v636_v55 = vpop.f32.mrf.mxu0 }
 0x21e   : >> { %v2678_v35 = vadd.f32 %v636_v55, %v586_v44  ;;  %v722_v44 = vsel %vm679_vm7, %v1798_v59, 0.0 }
 0x220   : >> { %v710_v36 = vperm.slane %v2678_v35, 0  ;;  %v1005_v31 = vperm.slane %v2678_v35, 3  ;;  %v907_v52 = vperm.slane %v2678_v35, 2  ;;  %v809_v26 = vperm.slane %v2678_v35, 1 }
 0x222   : >> { %v2683_v39 = vmul.f32 %v1005_v31, %v999_v25  ;;  %v1007_v29 = vmul.f32 %v1005_v31, %v1003_v34  ;;  %v2687_v28 = vmul.f32 %v907_v52, %v901_v30  ;;  %v711_v45 = vmul.f32 %v710_v36, %v703_v41 }
 0x223   : >> { %v712_v48 = vmul.f32 %v710_v36, %v708_v43 }
 0x224   : >> { %v713_v55 = vmax.f32 %v711_v45, 0.0 }
 0x225   : >> { %v638_v54 = vpop.f32.mrf.mxu0  ;;  %723 = vadd.xlane.f32.xlu1 %v722_v44  ;;  %v714_v0 = vmax.f32 %v712_v48, 0.0 }
 0x226   : >> { %v715_v1 = vmin.f32 %v713_v55, 1.0 }
 0x227   : >> { %v716_v2 = vmin.f32 %v714_v0, 1.0 }
 0x228   : >> { %v727_v27 = vmul.f32 %v1800_v3, %v715_v1 }
 0x229   : >> { %v728_v4 = vmul.f32 %v1798_v59, %v716_v2  ;;  %v2708_v2 = vsel %vm644_vm5, -1e+30, %v970_v53 }
 0x22a   : >> { %v977_v43 = vsel %vm679_vm7, %v2708_v2, -inf }
 0x22b   : >> { %v729_v25 = vpack.c.bf16 %v728_v4, %v727_v27  ;;  %v810_v27 = vmul.f32 %v809_v26, %v2653_v50 }
 0x22d   : >> { %1440 = vmatmul.msk.bf16.vlgmr.msra.gmra.mxu2 %vm679_vm7, %v729_v25  ;;  %v872_v31 = vpop.f32.mrf.mxu0  ;;  %v811_v25 = vmul.f32 %v809_v26, %v2655_v51 }
 0x22e   : >> { %v2694_v41 = vsel %vm644_vm5, -1e+30, %v872_v31 }
 0x22f   : >> { %v879_v30 = vsel %vm679_vm7, %v2694_v41, -inf }
 0x230   : >> { %880 = vmax.xlane.f32.xlu2 %v879_v30 }
 0x235   : >> { %v874_v34 = vpop.f32.mrf.mxu0 }
 0x236   : >> { %v2701_v0 = vsel %vm645_vm6, -1e+30, %v874_v34  ;;  %v812_v34 = vmax.f32 %v810_v27, 0.0  ;;  %v1009_v27 = vmax.f32 %v1007_v29, 0.0 }
 0x237   : >> { %v882_v1 = vsel %vm679_vm7, %v2701_v0, -inf }
 0x238   : >> { %883 = vmax.xlane.f32.xlu2 %v882_v1  ;;  %v813_v1 = vmax.f32 %v811_v25, 0.0  ;;  %v1011_v25 = vmin.f32 %v1009_v27, 1.0 }
 0x23d   : >> { %v783_v4 = vpop.xlane.xlu1 %782 }
 0x23e   : >> { %v2711_v59 = vmax.f32 %v2193_v18, %v783_v4   ;;  %v814_v4 = vmin.f32 %v812_v34, 1.0 }
 0x240   : >> { %v789_v36 = vsub.f32 %v2193_v18, %v2711_v59  ;;  %v795_v45 = vsub.f32 %v2642_v42, %v2711_v59  ;;  %978 = vmax.xlane.f32.xlu2 %v977_v43  ;;  %v815_v43 = vmin.f32 %v813_v1, 1.0 }
 0x242   : >> { %v797_v48 = vmul.f32 1.442695, %v795_v45 }
 0x244   : >> { %1801 = vpow2.f32 %v797_v48 }
 0x245   : >> { %v786_v44 = vpop.xlane.xlu1 %785 }
 0x246   : >> { %v2721_v53 = vmax.f32 %v2189_v17, %v786_v44  }
 0x248   : >> { %v796_v55 = vsub.f32 %v2649_v47, %v2721_v53 }
 0x24a   : >> { %v799_v42 = vmul.f32 1.442695, %v796_v55  ;;  %v1802_v31 = vpop.eup %1801 }
 0x24b   : >> { %v818_v30 = vsel %vm679_vm7, %v1802_v31, 0.0  ;;  %v826_v48 = vmul.f32 %v1802_v31, %v814_v4 }
 0x24c   : >> { %1803 = vpow2.f32 %v799_v42  ;;  %819 = vadd.xlane.f32.xlu0 %v818_v30  ;;  %v719_v30 = vsel %vm679_vm7, %v1800_v3, 0.0 }
 0x252   : >> { %v1804_v45 = vpop.eup %1803 }
 0x253   : >> { %v827_v44 = vmul.f32 %v1804_v45, %v815_v43  ;;  %v821_v1 = vsel %vm679_vm7, %v1804_v45, 0.0 }
 0x255   : >> { %v982_v54 = vpop.xlane.xlu1 %981  ;;  %v828_v50 = vpack.c.bf16 %v827_v44, %v826_v48  ;;  %v2998_v48 = vsub.f32 %v2217_v24, %v2668_v38  ;;  %v905_v24 = vpop.permute.xlu0 %904 }
 0x256   : >> { %v2731_v47 = vmax.f32 %v2141_v5, %v982_v54  }
 0x257   : >> { %1442 = vmatmul.msk.bf16.vlgmr.msrb.gmra.mxu2 %vm679_vm7, %v828_v50  ;;  %v690_v44 = vmul.f32 1.442695, %v2998_v48 }
 0x258   : >> { %v986_v51 = vsub.f32 %v2141_v5, %v2731_v47  ;;  %v992_v26 = vsub.f32 %v2660_v57, %v2731_v47  ;;  %1025 = vrot.lane.b32.xlu2 %v2601_v40, %s2231_s26  ;;  %v2996_v57 = vsub.f32 %v2213_v23, %v2665_v37  ;;  %s1949_s26 = sshra.s32 (%p2830_p1), %s1169_s24, 4  ;;  %s1950_s26 = int_to_ptr.hbm [resolvable:$true] %s1949_s26 }
 0x259   : > { %s1951_s11 = scalar_lea.hbm (%p2830_p1), %s1950_s26, 16  ;;  %p1956_p6 = scmp.lt.s32.totalorder (%p2830_p1), %s1950_s26, %s2965_s8 }
 0x25a   : >> { %v995_v55 = vmul.f32 1.442695, %v992_v26  ;;  %v692_v34 = vmul.f32 1.442695, %v2996_v57  ;;  %v909_v57 = vmul.f32 %v907_v52, %v905_v24  ;;  %p1952_p2 = scmp.ne.s32.totalorder (%p2830_p1), %s1950_s26, %s1951_s11  ;;  %p1957_p7 = scmp.lt.s32.totalorder (%p2830_p1), %s1955_s14, %s1951_s11 }
 0x25c   : >> { %1805 = vpow2.f32 %v995_v55  ;;  %p1953_p3 = pnand (%p2830_p1), %p1952_p2, %p2326_p4  ;;  %p1958_p9 = por (%p2830_p1), %p1957_p7, %p1956_p6 }
 0x25d   : >> { %1807 = vpow2.f32 %v692_v34 }
 0x25e   : >> { %1809 = vpow2.f32 %v690_v44  ;;  %p1954_p5 = pneg (%p2830_p1), %p1953_p3 }
 0x260   : > { %p1959_p10 = pnand (%p2830_p1), %p1958_p9, %p1954_p5 }
 0x262   : >> { %v1806_v42 = vpop.eup %1805 }
 0x263   : >> { %v2740_v31 = vmul.f32 %v1806_v42, %v1011_v25  ;;  %v1808_v40 = vpop.eup %1807 }
 0x264   : >> { %v718_v29 = vmul.f32 %v2205_v21, %v1808_v40  ;;  %v1810_v27 = vpop.eup %1809  ;;  %v752_v18 = vmul.f32 %v2197_v19, %v1808_v40  ;;  %v1008_v40 = vmax.f32 %v2683_v39, 0.0  ;;  %v3002_v39 = vsub.f32 %v2189_v17, %v2721_v53 }
 0x26d   : >> { %v928_v54 = vpop.permute.xlu1 %927 }
 0x26e   : >> { %940 = vmatpush.bf16.msrb.mxu1 %v928_v54 }
 0x281   : >> { %720 = vadd.xlane.f32.xlu2 %v719_v30  ;;  %v751_v30 = vmul.f32 %v2201_v20, %v1810_v27 }
 0x289   : >> { %822 = vadd.xlane.f32.xlu2 %v821_v1 }
 0x298   : >> { %v724_v4 = vpop.xlane.xlu1 %723 }
 0x299   : >> { %v2748_v21 = vadd.f32 %v724_v4, %v718_v29   ;;  %v791_v4 = vmul.f32 1.442695, %v789_v36 }
 0x29b   : >> { %v2997_v43 = vmov %v2748_v21 }
 0x2a3   : >> { %v881_v3 = vpop.xlane.xlu2 %880 }
 0x2a4   : >> { %v2754_v50 = vmax.f32 %v2169_v12, %v881_v3   ;;  %v911_v3 = vmax.f32 %v909_v57, 0.0 }
 0x2a6   : >> { %v887_v23 = vsub.f32 %v2169_v12, %v2754_v50  ;;  %v893_v45 = vsub.f32 %v2694_v41, %v2754_v50 }
 0x2a8   : >> { %v895_v26 = vmul.f32 1.442695, %v893_v45  ;;  %v913_v45 = vmin.f32 %v911_v3, 1.0 }
 0x2aa   : >> { %1811 = vpow2.f32 %v895_v26 }
 0x2ab   : >> { %v884_v55 = vpop.xlane.xlu2 %883 }
 0x2ac   : >> { %v2761_v21 = vmax.f32 %v2165_v11, %v884_v55  }
 0x2ae   : >> { %v888_v25 = vsub.f32 %v2165_v11, %v2761_v21  ;;  %v894_v54 = vsub.f32 %v2701_v0, %v2761_v21  ;;  %v910_v0 = vmax.f32 %v2687_v28, 0.0 }
 0x2b0   : >> { %v897_v41 = vmul.f32 1.442695, %v894_v54  ;;  %v746_v34 = vpop.f32.mrf.mxu2  ;;  %v1812_v1 = vpop.eup %1811  ;;  %v912_v36 = vmin.f32 %v910_v0, 1.0 }
 0x2b1   : >> { %v2770_v20 = vadd.f32 %v751_v30, %v746_v34   ;;  %v916_v48 = vsel %vm679_vm7, %v1812_v1, 0.0  ;;  %v1017_v30 = vsel %vm679_vm7, %v1806_v42, 0.0 }
 0x2b2   : >> { %1813 = vpow2.f32 %v897_v41  ;;  %917 = vadd.xlane.f32.xlu1 %v916_v48  ;;  %v924_v57 = vmul.f32 %v1812_v1, %v912_v36 }
 0x2b3   : >> { %v2999_v29 = vmov %v2770_v20  ;;  %v979_v44 = vpop.xlane.xlu2 %978  ;;  %1815 = vpow2.f32 %v791_v4 }
 0x2b4   : >> { %v2778_v35 = vmax.f32 %v2145_v6, %v979_v44  }
 0x2b6   : >> { %v985_v52 = vsub.f32 %v2145_v6, %v2778_v35  ;;  %v991_v20 = vsub.f32 %v2708_v2, %v2778_v35 }
 0x2b8   : >> { %v993_v26 = vmul.f32 1.442695, %v991_v20  ;;  %v748_v55 = vpop.f32.mrf.mxu2  ;;  %v1814_v24 = vpop.eup %1813  ;;  %v793_v20 = vmul.f32 1.442695, %v3002_v39 }
 0x2b9   : >> { %v2785_v19 = vadd.f32 %v752_v18, %v748_v55   ;;  %v919_v54 = vsel %vm679_vm7, %v1814_v24, 0.0  ;;  %v925_v41 = vmul.f32 %v1814_v24, %v913_v45  ;;  %v1816_v2 = vpop.eup %1815 }
 0x2ba   : >> { %1817 = vpow2.f32 %v993_v26  ;;  %920 = vadd.xlane.f32.xlu0 %v919_v54  ;;  %1018 = vadd.xlane.f32.xlu1 %v1017_v30  ;;  %v816_v4 = vmul.f32 %v2185_v16, %v1816_v2  ;;  %v849_v18 = vmul.f32 %v2177_v14, %v1816_v2 }
 0x2bb   : >> { %v3000_v28 = vmov %v2785_v19  ;;  %v1026_v6 = vpop.permute.xlu2 %1025  ;;  %v926_v34 = vpack.c.bf16 %v925_v41, %v924_v57  ;;  %v1010_v19 = vmin.f32 %v1008_v40, 1.0  ;;  %1819 = vpow2.f32 %v793_v20 }
 0x2bc   : >> { %1038 = vmatpush.bf16.msra.mxu2 %v1026_v6  ;;  %v989_v6 = vmul.f32 1.442695, %v986_v51 }
 0x2bd   : >> { %1444 = vmatmul.msk.bf16.vlgmr.msrb.gmra.mxu1 %vm679_vm7, %v926_v34 }
 0x2bf   : >> { %v820_v48 = vpop.xlane.xlu0 %819 }
 0x2c0   : >> { %v1818_v44 = vpop.eup %1817  ;;  %v2792_v16 = vadd.f32 %v820_v48, %v816_v4  }
 0x2c1   : >> { %v1022_v1 = vmul.f32 %v1818_v44, %v1010_v19  ;;  %v1014_v0 = vsel %vm679_vm7, %v1818_v44, 0.0  ;;  %v1820_v26 = vpop.eup %1819 }
 0x2c2   : >> { %v3001_v42 = vmov %v2792_v16  ;;  %1015 = vadd.xlane.f32.xlu2 %v1014_v0  ;;  %v850_v16 = vmul.f32 %v2173_v13, %v1820_v26  ;;  %v817_v17 = vmul.f32 %v2181_v15, %v1820_v26 }
 0x2c3   : >> { %v1024_v3 = vpack.c.bf16 %v2740_v31, %v1022_v1  ;;  %v717_v31 = vmul.f32 %v2209_v22, %v1810_v27 }
 0x2c5   : >> { %1446 = vmatmul.msk.bf16.vlgmr.msra.gmra.mxu2 %vm679_vm7, %v1024_v3 }
 0x2da   : >> { %v844_v36 = vpop.f32.mrf.mxu2 }
 0x2db   : >> { %v2801_v14 = vadd.f32 %v849_v18, %v844_v36  }
 0x2dd   : >> { %v3003_v45 = vmov %v2801_v14  ;;  %v889_v14 = vmul.f32 1.442695, %v887_v23 }
 0x2df   : >> { %1821 = vpow2.f32 %v889_v14  ;;  %v3021_v14 = vmov %v3003_v45 }
 0x2e0   : >> { %1823 = vpow2.f32 %v989_v6  ;;  %v3013_v6 = vmov %v2778_v35 }
 0x2e2   : >> { %v846_v55 = vpop.f32.mrf.mxu2 }
 0x2e3   : >> { %v2804_v13 = vadd.f32 %v850_v16, %v846_v55   ;;  %v3023_v16 = vmov %v3001_v42 }
 0x2e5   : >> { %v3004_v54 = vmov %v2804_v13  ;;  %v891_v13 = vmul.f32 1.442695, %v888_v25  ;;  %v1822_v27 = vpop.eup %1821 }
 0x2e6   : >> { %v1824_v34 = vpop.eup %1823 }
 0x2e7   : >> { %1825 = vpow2.f32 %v891_v13  ;;  %v1013_v5 = vmul.f32 %v2133_v62, %v1824_v34  ;;  %v1046_v20 = vmul.f32 %v2125_v60, %v1824_v34  ;;  %v3020_v13 = vmov %v3004_v54 }
 0x2ed   : >> { %v1826_v12 = vpop.eup %1825 }
 0x2ee   : >> { %v915_v23 = vmul.f32 %v2157_v9, %v1826_v12  ;;  %v948_v3 = vmul.f32 %v2149_v7, %v1826_v12  ;;  %v3019_v12 = vmov %v2754_v50 }
 0x2f4   : >> { %v721_v24 = vpop.xlane.xlu2 %720 }
 0x2f5   : >> { %v2807_v22 = vadd.f32 %v721_v24, %v717_v31   ;;  %v3031_v24 = vmov %v2668_v38 }
 0x2f7   : >> { %v3005_v30 = vmov %v2807_v22  ;;  %v914_v22 = vmul.f32 %v2161_v10, %v1822_v27  ;;  %v947_v10 = vmul.f32 %v2153_v8, %v1822_v27 }
 0x2fc   : >> { %v823_v57 = vpop.xlane.xlu2 %822 }
 0x2fd   : >> { %v2810_v15 = vadd.f32 %v823_v57, %v817_v17   ;;  %v3024_v17 = vmov %v2721_v53 }
 0x2fe   : > { %v1483_v17 = vld [vmem:[#allocation9] sm:$0xff] (%p2830_p1) }
 0x2ff   : >> { %v3006_v41 = vmov %v2810_v15  ;;  %v987_v15 = vmul.f32 1.442695, %v985_v52 }
 0x301   : >> { %1827 = vpow2.f32 %v987_v15  ;;  %v3022_v15 = vmov %v3006_v41 }
 0x302   : > { %1829 = vrcp.f32 (%p2830_p1), %v3001_v42 }
 0x307   : >> { %v1828_v11 = vpop.eup %1827 }
 0x308   : >> { %v1012_v25 = vmul.f32 %v2137_v63, %v1828_v11  ;;  %v1045_v9 = vmul.f32 %v2129_v61, %v1828_v11  ;;  %v3018_v11 = vmov %v2761_v21  ;;  %v3028_v21 = vmov %v2997_v43 }
 0x325   : >> { %v918_v2 = vpop.xlane.xlu1 %917 }
 0x326   : >> { %v922_v40 = vadd.f32 %v918_v2, %v914_v22   ;;  %v3029_v22 = vmov %v3005_v30 }
 0x328   : > { %1831 = vrcp.f32 (%p2830_p1), %v922_v40 }
 0x329   : > { %1833 = vrcp.f32 (%p2830_p1), %v3006_v41 }
 0x32d   : >> { %v921_v51 = vpop.xlane.xlu0 %920  ;;  %v1019_v4 = vpop.xlane.xlu1 %1018 }
 0x32e   : >> { %v923_v48 = vadd.f32 %v921_v51, %v915_v23   ;;  %v1021_v44 = vadd.f32 %v1019_v4, %v1013_v5   ;;  %v3012_v5 = vmov %v2731_v47  ;;  %v3030_v23 = vmov %v2665_v37 }
 0x330   : > { %1835 = vrcp.f32 (%p2830_p1), %v923_v48 }
 0x335   : >> { %v1016_v19 = vpop.xlane.xlu2 %1015 }
 0x336   : >> { %v1020_v1 = vadd.f32 %v1016_v19, %v1012_v25   ;;  %v3026_v19 = vmov %v3000_v28 }
 0x338   : >> { %v3011_v63 = vmov %v1020_v1  ;;  %1837 = vrcp.f32 (%p2830_p1), %v1020_v1 }
 0x339   : > { %1839 = vrcp.f32 (%p2830_p1), %v1021_v44 }
 0x33a   : >> { %v942_v0 = vpop.f32.mrf.mxu1  ;;  %1841 = vrcp.f32 (%p2830_p1), %v3005_v30 }
 0x33b   : >> { %v949_v52 = vadd.f32 %v947_v10, %v942_v0   ;;  %v3017_v10 = vmov %v922_v40  ;;  %1843 = vrcp.f32 (%p2830_p1), %v2997_v43 }
 0x33d   : >> { %v3015_v8 = vmov %v949_v52 }
 0x342   : >> { %v944_v39 = vpop.f32.mrf.mxu1 }
 0x343   : >> { %v950_v36 = vadd.f32 %v948_v3, %v944_v39  }
 0x345   : >> { %v3014_v7 = vmov %v950_v36 }
 0x348   : >> { %v1040_v62 = vpop.f32.mrf.mxu2 }
 0x349   : >> { %v1047_v26 = vadd.f32 %v1045_v9, %v1040_v62   ;;  %v3010_v62 = vmov %v1021_v44  ;;  %v3016_v9 = vmov %v923_v48 }
 0x34b   : >> { %v3009_v61 = vmov %v1047_v26 }
 0x34f   : > { %546 = sbr.rel (!%p2830_p1) target bundleno = 196 (0xc4), region = 115 }
 0x350   : >> { %v1042_v18 = vpop.f32.mrf.mxu2 }
 0x351   : >> { %v1048_v55 = vadd.f32 %v1046_v20, %v1042_v18   ;;  %v3025_v18 = vmov %v2711_v59  ;;  %v3027_v20 = vmov %v2999_v29  ;;  %v1830_v59 = vpop.eup (%p2830_p1), %1829 }
 0x352   : > { %v1832_v53 = vpop.eup (%p2830_p1), %1831  ;;  %v1060_v47 = vmul.f32 (%p2830_p1), %v1830_v59, %v3003_v45 }
 0x353   : >> { %v3008_v60 = vmov %v1048_v55  ;;  %v1834_v37 = vpop.eup (%p2830_p1), %1833  ;;  %v1077_v50 = vmul.f32 (%p2830_p1), %v1832_v53, %v949_v52 }
 0x354   : > { %v1836_v35 = vpop.eup %1835  ;;  %v1062_v38 = vpack.c.bf16 %v1060_v47, %v1060_v47  ;;  %v1061_v32 = vmul.f32 %v1834_v37, %v3004_v54  ;;  %v1484_v54 = vld [vmem:[#allocation9 + $0x8] sm:$0xff] }
 0x355   : > { %v1838_v31 = vpop.eup %1837  ;;  %v1079_v24 = vpack.c.bf16 %v1077_v50, %v1077_v50  ;;  %v1078_v49 = vmul.f32 %v1836_v35, %v950_v36  ;;  %1141 = vmatpush.bf16.msra.mxu0 %v1484_v54 }
 0x356   : > { %1066 = vrot.lane.b32.xlu0 %v1062_v38, %s2237_s22  ;;  %v1094_v33 = vmul.f32 %v1838_v31, %v1047_v26  ;;  %v1840_v46 = vpop.eup %1839  ;;  %v1063_v58 = vpack.c.bf16 %v1061_v32, %v1061_v32 }
 0x357   : > { %1083 = vrot.lane.b32.xlu1 %v1079_v24, %s2238_s25  ;;  %v1095_v60 = vmul.f32 %v1840_v46, %v1048_v55  ;;  %v1080_v61 = vpack.c.bf16 %v1078_v49, %v1078_v49  ;;  %v1842_v7 = vpop.eup %1841 }
 0x358   : > { %v1096_v56 = vpack.c.bf16 %v1094_v33, %v1094_v33  ;;  %v1051_v8 = vmul.f32 %v1842_v7, %v2999_v29  ;;  %v1844_v42 = vpop.eup %1843 }
 0x359   : > { %v1097_v63 = vpack.c.bf16 %v1095_v60, %v1095_v60  ;;  %v1052_v45 = vmul.f32 %v1844_v42, %v3000_v28  ;;  %1142 = vmatpush.bf16.msra.mxu0 %v1483_v17 }
 0x35a   : > { %1100 = vrot.lane.b32.xlu2 %v1096_v56, %s2239_s23  ;;  %v1053_v21 = vpack.c.bf16 %v1051_v8, %v1051_v8 }
 0x35b   : > { %v1054_v16 = vpack.c.bf16 %v1052_v45, %v1052_v45 }
 0x35c   : > { %1056 = vst.msk [vmem:[#allocation3] sm:$0xf] %vm1055_vm8, %v1053_v21 }
 0x35d   : > { %1057 = vst.msk [vmem:[#allocation3 + $0x4] sm:$0xf] %vm1055_vm8, %v1054_v16 }
 0x35e   : > { %1068 = vrot.lane.b32.xlu0 %v1063_v58, %s2237_s22 }
 0x35f   : > { %1085 = vrot.lane.b32.xlu1 %v1080_v61, %s2238_s25 }
 0x362   : > { %1102 = vrot.lane.b32.xlu2 %v1097_v63, %s2239_s23 }
 0x3b4   : > { %v1101_v57 = vpop.permute.xlu2 %1100 }
 0x3bc   : > { %v1103_v28 = vpop.permute.xlu2 %1102 }
 0x3c8   : > { %v1067_v30 = vpop.permute.xlu0 %1066 }
 0x3c9   : > { %1073 = vst.msk [vmem:[#allocation3] sm:$0xf] %vm1072_vm9, %v1067_v30  ;;  %v1084_v43 = vpop.permute.xlu1 %1083 }
 0x3ca   : > { %1090 = vst.msk [vmem:[#allocation3] sm:$0xf] %vm1089_vm10, %v1084_v43 }
 0x3cb   : > { %1107 = vst.msk [vmem:[#allocation3] sm:$0xf] %vm1106_vm11, %v1101_v57 }
 0x3d0   : > { %v1069_v29 = vpop.permute.xlu0 %1068 }
 0x3d1   : > { %1074 = vst.msk [vmem:[#allocation3 + $0x4] sm:$0xf] %vm1072_vm9, %v1069_v29  ;;  %v1086_v41 = vpop.permute.xlu1 %1085 }
 0x3d2   : > { %1091 = vst.msk [vmem:[#allocation3 + $0x4] sm:$0xf] %vm1089_vm10, %v1086_v41 }
 0x3d3   : > { %1108 = vst.msk [vmem:[#allocation3 + $0x4] sm:$0xf] %vm1106_vm11, %v1103_v28 }
 0x3da   : > { %v1482_v14 = vld [vmem:[#allocation3] sm:$0xff] }
 0x3db   : > { %1459 = vmatmul.msk.bf16.vlgmr.msra.gmra.mxu0 %vm411_vm0, %v1482_v14 }
 0x458   : > { %v1144_v6 = vpop.f32.mrf.mxu0 }
 0x459   : > { %1149 = vst.msk [vmem:[%s2450_s18] sm:$0xff] %vm411_vm0, %v1144_v6 }
 0x460   : > { %v1146_v13 = vpop.f32.mrf.mxu0 }
 0x461   : > { %1150 = vst.msk [vmem:[%s2450_s18 + $0x8] sm:$0xff] %vm411_vm0, %v1146_v13 }
 0x462   : > { %1962 = shalt.err (!%p1959_p10)
}
 0x463   : > { %s2240_s3 = smov 128  }
 0x464   : > { %1498 = dma.vmem_to_hbm [thread:$0]  (%p2326_p4), %s1167_s19, 256, %s1169_s24, %s1152_s20, %s2240_s3, %s2240_s3, %s2237_s22  }
 0x465 PF: > { %p1520_p11 = scmp.ge.s32.totalorder %s2121_s10, 2  ;;  %s1183_s25 = sand.u32 1, %s2101_s27  }
 0x466   : > { %s1184_s23 = scalar_lea.sflag [#allocation6], %s1183_s25 }
 0x467   : > { %p1511_p12 = pnand %p1520_p11, %p2333_p8 }
 0x469   : > { %p1512_p13 = pneg %p1511_p12 }
 0x46b   : > { %2096 = dma.done.wait (%p1512_p13), %s1184_s23, 256  }
 0x46c   : > { %2098 = vsyncadd (%p1512_p13), %s1184_s23, 4294967040  ;;  %s23_s10 = sadd.s32 1, %s2121_s10   ;;  %s3033_s9 = sld [smem:[#allocation14_spill]] }
 0x46d   : > { %p20_p0 = scmp.ge.s32.totalorder %s23_s10, 4   ;;  %s3034_s29 = sld [smem:[#allocation18_spill]] }
 0x46e   : > { %s3035_s30 = sld [smem:[#allocation15_spill]]  ;;  %s3037_s27 = smov %s2105_s28 }
 0x46f   : > { %s3036_s15 = sld [smem:[#allocation16_spill]] }
 0x471   :  { %22 = sbr.rel (!%p20_p0) target bundleno = 8 (0x8), region = 126 }
 0x472   : > { %s3038_s28 = smov %s3033_s9 }
 0x475   : > { %s3039_s9 = smov %s3036_s15 }
 0x476   :  { %1190 = vsyncpa [#allocation5], 1 }
 0x477   :  { %1192 = vsyncpa [#allocation5 + $0x1], 1 }
 0x478   :  { %1193 = vsyncpa [#allocation8], 1 }
 0x479   :  { %1194 = vsyncpa [#allocation6], 1 }
 0x47a   :  { %1196 = vsyncpa [#allocation6 + $0x1], 1 }

</bundles_post_ra>
